<compile_context>
chip_gen: v7x
topology: tpu7x:2x2x1
jax: 0.10.0
libtpu: 0.0.40
codegen_flags: <defaults>
</compile_context>

<pallas_src>
import numpy as np
import jax
import jax.numpy as jnp
from jax.experimental import pallas as pl
from jax.experimental.pallas import tpu as pltpu

EPS = 1e-6

# ----------------------------- configuration --------------------------------
B = 2
C_IN = 16            # in_dim
C_OUT = 16           # out_dim
H = W = 16
K = 3                # kernel_size (odd -> branch shapes match)
S = 2                # stride
PAD = K // 2
HD = (H + 2 * PAD - K) // S + 1
WD = (W + 2 * PAD - K) // S + 1
assert HD == H // S and WD == W // S
HW = H * W           # 256
HWD = HD * WD        # 64
NBH = B * HW         # 512 lane axis, full-res stage (batch-major)
NBD = B * HWD        # 128 lane axis, downsampled stage (batch-major)
C4 = C_OUT // 4      # reweight Mlp hidden
MLP_HID = 2 * C_OUT  # mlp_ratio = 2
BASE = 128           # aligned column offset of the real data inside the staging buffer
YBUF_W = BASE + NBH + 128


# ------------------------------ small helpers -------------------------------
def _gelu(x):
    # tanh-approximation GELU (single EUP tanh; |err| vs exact erf GELU < ~1e-3)
    return 0.5 * x * (1.0 + jnp.tanh(0.7978845608028654 * (x + 0.044715 * x * x * x)))


# --------------------------- the fused GCM kernel ----------------------------
def _gcm_kernel(x_ref, ds_ref, mask_ref, p_ref, o_ref, ybuf):
    # ---------- norm1 (affine folded into the 1x1 convs) ----------
    x = x_ref[...]                                           # (C_IN, B*HW) f32
    mu = jnp.mean(x, axis=0, keepdims=True)
    xc = x - mu
    var = jnp.mean(xc * xc, axis=0, keepdims=True)
    xhat = xc * jax.lax.rsqrt(var + EPS)                     # (16, 512)

    # ---------- block branch: folded 1x1 conv, then the stride-S depthwise conv ----------
    yb = (jnp.dot(p_ref[0:16, 0:16], xhat, preferred_element_type=jnp.float32)
          + p_ref[0:16, 80:81])                              # (16, 512)

    # Stage yb into a zero-padded VMEM buffer; the 9 taps are statically-shifted slice
    # reads of it (ld-slot), accumulated on the VPU with per-tap (channel x validity)
    # weights, then subsampled with ONE lane-dense matmul (replaces 9 tiny MXU dots).
    ybuf[:, 0:BASE] = jnp.zeros((C_OUT, BASE), ybuf.dtype)
    ybuf[:, BASE + NBH:YBUF_W] = jnp.zeros((C_OUT, YBUF_W - BASE - NBH), ybuf.dtype)
    ybuf[:, BASE:BASE + NBH] = yb
    acc = jnp.zeros((C_OUT, NBH), jnp.float32)
    for t in range(K * K):                                   # static unroll, 9 taps
        off = (t // K - PAD) * W + (t % K - PAD)             # flattened tap offset
        shifted = ybuf[:, BASE + off:BASE + off + NBH]       # (16, 512)
        tapw = p_ref[0:16, 32 + t:33 + t] * mask_ref[t:t + 1, :]
        acc = acc + tapw * shifted
    xb = jnp.dot(acc.astype(jnp.bfloat16), ds_ref[:, NBD:2 * NBD],
                 preferred_element_type=jnp.float32)         # (16, 128)

    # ---------- down branch: bilinear downsample folded BEFORE the 1x1 conv ----------
    xdn = jnp.dot(xhat.astype(jnp.bfloat16), ds_ref[:, 0:NBD],
                  preferred_element_type=jnp.float32)        # (16, 128)
    dx = (jnp.dot(p_ref[0:16, 16:32], xdn, preferred_element_type=jnp.float32)
          + p_ref[0:16, 81:82])                              # (16, 128)

    # ---------- reweight Mlp on the pooled branch sum + per-branch softmax ----------
    f = xb + dx
    lane = jax.lax.broadcasted_iota(jnp.int32, (1, NBD), 1)
    in_b1 = lane >= HWD                                      # columns belonging to batch 1
    sum0 = jnp.sum(jnp.where(in_b1, 0.0, f), axis=1, keepdims=True)
    sum1 = jnp.sum(jnp.where(in_b1, f, 0.0), axis=1, keepdims=True)
    pooled = jnp.where(jax.lax.broadcasted_iota(jnp.int32, (C_OUT, B), 1) == 0,
                       sum0, sum1) * (1.0 / HWD)             # (C_OUT, B): both batches at once
    h1 = _gelu(jnp.dot(p_ref[0:4, 96:112], pooled,
                       preferred_element_type=jnp.float32) + p_ref[0:4, 112:113])
    logits = (jnp.dot(p_ref[16:48, 32:36], h1, preferred_element_type=jnp.float32)
              + p_ref[16:48, 36:37])                         # (2*C_OUT, B), branch-major rows
    l0 = logits[0:C_OUT, :]
    l1 = logits[C_OUT:2 * C_OUT, :]
    mx = jnp.maximum(l0, l1)
    e0 = jnp.exp(l0 - mx)
    e1 = jnp.exp(l1 - mx)
    inv = pl.reciprocal(e0 + e1, approx=True)
    w0 = e0 * inv
    w1 = e1 * inv                                            # (C_OUT, B)
    w0f = jnp.where(in_b1, w0[:, 1:2], w0[:, 0:1])           # broadcast per-batch weights
    w1f = jnp.where(in_b1, w1[:, 1:2], w1[:, 0:1])           # across that batch's columns
    xm = w0f * xb + w1f * dx                                 # (16, 128)

    # ---------- norm2 (affine folded into mlp.fc1) + channel MLP + residual ----------
    mu2 = jnp.mean(xm, axis=0, keepdims=True)
    xc2 = xm - mu2
    var2 = jnp.mean(xc2 * xc2, axis=0, keepdims=True)
    xh2 = xc2 * jax.lax.rsqrt(var2 + EPS)
    h = _gelu(jnp.dot(p_ref[16:48, 0:16], xh2, preferred_element_type=jnp.float32)
              + p_ref[16:48, 16:17])                         # (32, 128)
    mlp = (jnp.dot(p_ref[0:16, 48:80], h, preferred_element_type=jnp.float32)
           + p_ref[0:16, 82:83])                             # (16, 128)
    o_ref[...] = xm + mlp                                    # full unmasked 128-lane store


@jax.jit
def gcm_pallas(x_nchw, dsmat, tapmask, pslab):
    # NCHW -> channels-first with (batch, flattened spatial) folded onto the lane axis.
    xcf = jnp.transpose(x_nchw, (1, 0, 2, 3)).reshape(C_IN, NBH).astype(jnp.float32)
    out = pl.pallas_call(
        _gcm_kernel,
        out_shape=jax.ShapeDtypeStruct((C_OUT, NBD), jnp.float32),
        scratch_shapes=[pltpu.VMEM((C_OUT, YBUF_W), jnp.float32)],
    )(xcf, dsmat, tapmask, pslab)
    return jnp.transpose(out.reshape(C_OUT, B, HD, WD), (1, 0, 2, 3))


# --------------------------- host-side constants ------------------------------
def interp_matrix(n_out, n_in):
    # nn.UpsamplingBilinear2d => align_corners=True
    M = np.zeros((n_out, n_in), np.float32)
    if n_out == 1:
        M[0, 0] = 1.0
        return M
    scale = (n_in - 1) / (n_out - 1)
    for o in range(n_out):
        src = o * scale
        i0 = int(np.floor(src))
        i1 = min(i0 + 1, n_in - 1)
        w1 = src - i0
        M[o, i0] += 1.0 - w1
        M[o, i1] += w1
    return M


def build_dsmat(Rh, Rw):
    # One bf16 slab: cols [0:NBD] = per-batch block-diag bilinear-downsample matrix (M^T),
    #                cols [NBD:2*NBD] = per-batch block-diag stride-S one-hot subsample.
    MT = np.kron(Rh, Rw).T.astype(np.float32)                 # (HW, HWD)
    SUB = np.zeros((HW, HWD), np.float32)
    for i in range(HD):
        for j in range(WD):
            SUB[(S * i) * W + S * j, i * WD + j] = 1.0
    eye = np.eye(B, dtype=np.float32)
    ds = np.concatenate([np.kron(eye, MT), np.kron(eye, SUB)], axis=1)  # (NBH, 2*NBD)
    return jnp.asarray(ds, dtype=jnp.bfloat16)


def build_tap_mask():
    # mask[t, h*W+w] = 1 iff tap t=(kh,kw) reads a real (non zero-padding, same-row,
    # same-batch) pixel; it zeroes every shifted read that crosses a row/batch boundary.
    m = np.zeros((K * K, HW), np.float32)
    for t in range(K * K):
        dh, dw = t // K - PAD, t % K - PAD
        for h in range(H):
            for w in range(W):
                if 0 <= h + dh < H and 0 <= w + dw < W:
                    m[t, h * W + w] = 1.0
    return jnp.asarray(np.tile(m, (1, B)))                    # (K*K, NBH)


def pack_params(P, perm):
    # All parameters in one (48, 128) f32 slab = one DMA; static in-kernel ref slices.
    a = lambda v: np.asarray(v, np.float32)
    g1, b1, g2, b2 = a(P['g1']), a(P['b1']), a(P['g2']), a(P['b2'])
    s = np.zeros((48, 128), np.float32)
    s[0:16, 0:16] = a(P['wb']) * g1[None, :]                  # block 1x1 conv (norm1 affine folded)
    s[0:16, 16:32] = a(P['wd']) * g1[None, :]                 # down  1x1 conv (norm1 affine folded)
    s[0:16, 32:32 + K * K] = np.transpose(a(P['wdw']), (2, 0, 1)).reshape(C_OUT, K * K)
    s[0:16, 48:80] = a(P['mw2'])                              # mlp fc2
    s[0:16, 80] = a(P['wb']) @ b1                             # block-branch bias (Wb @ b1)
    s[0:16, 81] = a(P['wd']) @ b1                             # down-branch bias  (Wd @ b1)
    s[0:16, 82] = a(P['mb2'])
    s[0:4, 96:112] = a(P['rw1'])                              # reweight fc1
    s[0:4, 112] = a(P['rb1'])
    s[16:48, 0:16] = a(P['mw1']) * g2[None, :]                # mlp fc1 (norm2 affine folded)
    s[16:48, 16] = a(P['mw1']) @ b2 + a(P['mb1'])
    s[16:48, 32:36] = a(P['rw2'])[perm]                       # reweight fc2, branch-major rows
    s[16:48, 36] = a(P['rb2'])[perm]
    return jnp.asarray(s)


# ------------------------------ pure-JAX reference ----------------------------
def gcm_reference(x_nchw, P, Rh, Rw):
    x = jnp.transpose(x_nchw, (0, 2, 3, 1)).astype(jnp.float32)           # NHWC

    def ln(t, g, b):
        mu = jnp.mean(t, axis=-1, keepdims=True)
        var = jnp.mean((t - mu) ** 2, axis=-1, keepdims=True)
        return (t - mu) / jnp.sqrt(var + EPS) * g + b

    gelu = lambda t: jax.nn.gelu(t, approximate=False)

    xn = ln(x, P['g1'], P['b1'])
    y_down = xn @ P['wd'].T
    y_block = xn @ P['wb'].T

    ybp = jnp.pad(y_block, ((0, 0), (PAD, PAD), (PAD, PAD), (0, 0)))
    xb = jnp.zeros((B, HD, WD, C_OUT), jnp.float32)
    for kh in range(K):
        for kw in range(K):
            xb = xb + ybp[:, kh:kh + S * HD:S, kw:kw + S * WD:S, :] * P['wdw'][kh, kw]

    dx = jnp.einsum('oh,bhwc->bowc', Rh, y_down)
    dx = jnp.einsum('pw,bowc->bopc', Rw, dx)

    pooled = jnp.mean(xb + dx, axis=(1, 2))                               # (B, C)
    hh = gelu(pooled @ P['rw1'].T + P['rb1'])
    logits = hh @ P['rw2'].T + P['rb2']                                   # (B, 2C)
    wts = jax.nn.softmax(logits.reshape(B, C_OUT, 2), axis=-1)
    f0 = wts[..., 0][:, None, None, :]
    f1 = wts[..., 1][:, None, None, :]
    xm = f0 * xb + f1 * dx
    mlp = gelu(ln(xm, P['g2'], P['b2']) @ P['mw1'].T + P['mb1']) @ P['mw2'].T + P['mb2']
    return (xm + mlp).transpose(0, 3, 1, 2)


# ----------------------------------- main ------------------------------------
if __name__ == "__main__":
    ks = jax.random.split(jax.random.PRNGKey(0), 16)
    nrm = lambda k, shp, sc: sc * jax.random.normal(k, shp, jnp.float32)
    P = {
        'g1':  1.0 + nrm(ks[0], (C_IN,), 0.1),
        'b1':  nrm(ks[1], (C_IN,), 0.1),
        'wd':  nrm(ks[2], (C_OUT, C_IN), 1.0 / np.sqrt(C_IN)),
        'wb':  nrm(ks[3], (C_OUT, C_IN), 1.0 / np.sqrt(C_IN)),
        'wdw': nrm(ks[4], (K, K, C_OUT), 1.0 / K),
        'rw1': nrm(ks[5], (C4, C_OUT), 1.0 / np.sqrt(C_OUT)),
        'rb1': nrm(ks[6], (C4,), 0.1),
        'rw2': nrm(ks[7], (2 * C_OUT, C4), 1.0 / np.sqrt(C4)),
        'rb2': nrm(ks[8], (2 * C_OUT,), 0.1),
        'g2':  1.0 + nrm(ks[9], (C_OUT,), 0.1),
        'b2':  nrm(ks[10], (C_OUT,), 0.1),
        'mw1': nrm(ks[11], (MLP_HID, C_OUT), 1.0 / np.sqrt(C_OUT)),
        'mb1': nrm(ks[12], (MLP_HID,), 0.1),
        'mw2': nrm(ks[13], (C_OUT, MLP_HID), 1.0 / np.sqrt(MLP_HID)),
        'mb2': nrm(ks[14], (C_OUT,), 0.1),
    }
    x = jax.random.normal(ks[15], (B, C_IN, H, W), jnp.float32)

    Rh = interp_matrix(HD, H)
    Rw = interp_matrix(WD, W)
    # branch-major permutation of reweight fc2 so the kernel avoids strided slicing
    perm = np.concatenate([np.arange(0, 2 * C_OUT, 2), np.arange(1, 2 * C_OUT, 2)])
    dsmat = build_dsmat(Rh, Rw)
    tapmask = build_tap_mask()
    pslab = pack_params(P, perm)

    out = jax.block_until_ready(gcm_pallas(x, dsmat, tapmask, pslab))
    assert out.shape == (B, C_OUT, HD, WD), out.shape

    ref = gcm_reference(x, P, jnp.asarray(Rh), jnp.asarray(Rw))
    max_err = float(jnp.max(jnp.abs(out - ref)))
    mean_err = float(jnp.mean(jnp.abs(out - ref)))
    # loose tolerance: bf16 operands on the two big constant matmuls, tanh-approx GELU,
    # approx reciprocal in the branch softmax, default-precision f32 MXU dots.
    assert max_err < 1e-1 and mean_err < 2.5e-2, (max_err, mean_err)
    print("KERNEL_OK")
</pallas_src>

<mosaic_0001>
module attributes {stable_mosaic.version = 11 : i64} {
  func.func @_gcm_kernel(%arg0: memref<16x512xf32, #tpu.memory_space<vmem>>, %arg1: memref<512x256xbf16, #tpu.memory_space<vmem>>, %arg2: memref<9x512xf32, #tpu.memory_space<vmem>>, %arg3: memref<48x128xf32, #tpu.memory_space<vmem>>, %arg4: memref<16x128xf32, #tpu.memory_space<vmem>>, %arg5: memref<16x768xf32, #tpu.memory_space<vmem>>) attributes {dimension_semantics = [], scalar_prefetch = 0 : i64, scratch_operands = 1 : i64, tpu.core_type = #tpu.core_type<tc>} {
    %c0 = arith.constant 0 : index
    %c0_0 = arith.constant 0 : index
    %0 = vector.load %arg0[%c0, %c0_0] : memref<16x512xf32, #tpu.memory_space<vmem>>, vector<16x512xf32>
    %cst = arith.constant dense<0.000000e+00> : vector<512xf32>
    %1 = vector.multi_reduction <add>, %0, %cst [0] : vector<16x512xf32> to vector<512xf32>
    %2 = vector.shape_cast %1 : vector<512xf32> to vector<1x512xf32>
    %cst_1 = arith.constant 1.600000e+01 : f32
    %3 = vector.broadcast %cst_1 : f32 to vector<1x512xf32>
    %4 = arith.divf %2, %3 : vector<1x512xf32>
    %5 = vector.broadcast %4 : vector<1x512xf32> to vector<16x512xf32>
    %6 = arith.subf %0, %5 : vector<16x512xf32>
    %7 = arith.mulf %6, %6 : vector<16x512xf32>
    %cst_2 = arith.constant dense<0.000000e+00> : vector<512xf32>
    %8 = vector.multi_reduction <add>, %7, %cst_2 [0] : vector<16x512xf32> to vector<512xf32>
    %9 = vector.shape_cast %8 : vector<512xf32> to vector<1x512xf32>
    %cst_3 = arith.constant 1.600000e+01 : f32
    %10 = vector.broadcast %cst_3 : f32 to vector<1x512xf32>
    %11 = arith.divf %9, %10 : vector<1x512xf32>
    %cst_4 = arith.constant 9.99999997E-7 : f32
    %12 = vector.broadcast %cst_4 : f32 to vector<1x512xf32>
    %13 = arith.addf %11, %12 : vector<1x512xf32>
    %14 = math.rsqrt %13 : vector<1x512xf32>
    %15 = vector.broadcast %14 : vector<1x512xf32> to vector<16x512xf32>
    %16 = arith.mulf %6, %15 : vector<16x512xf32>
    %c0_5 = arith.constant 0 : index
    %c0_6 = arith.constant 0 : index
    %17 = vector.load %arg3[%c0_5, %c0_6] : memref<48x128xf32, #tpu.memory_space<vmem>>, vector<16x16xf32>
    %cst_7 = arith.constant dense<0.000000e+00> : vector<16x512xf32>
    %18 = tpu.matmul %17, %16, %cst_7 {dimension_numbers = #tpu.dot_dimension_numbers<[1], [0], [0], [1], [0, 0, 1, 1], [], []>} : vector<16x16xf32>, vector<16x512xf32>, vector<16x512xf32> -> vector<16x512xf32>
    %c0_8 = arith.constant 0 : index
    %c80 = arith.constant 80 : index
    %19 = vector.load %arg3[%c0_8, %c80] : memref<48x128xf32, #tpu.memory_space<vmem>>, vector<16x1xf32>
    %20 = vector.broadcast %19 : vector<16x1xf32> to vector<16x512xf32>
    %21 = arith.addf %18, %20 : vector<16x512xf32>
    %cst_9 = arith.constant 0.000000e+00 : f32
    %22 = vector.broadcast %cst_9 : f32 to vector<16x128xf32>
    %c0_10 = arith.constant 0 : index
    %c0_11 = arith.constant 0 : index
    %23 = vector.load %arg5[%c0_10, %c0_11] : memref<16x768xf32, #tpu.memory_space<vmem>>, vector<16x128xf32>
    tpu.vector_store %arg5[%c0_10, %c0_11], %22 {strides = array<i32>} : memref<16x768xf32, #tpu.memory_space<vmem>>, vector<16x128xf32>,
    %cst_12 = arith.constant 0.000000e+00 : f32
    %24 = vector.broadcast %cst_12 : f32 to vector<16x128xf32>
    %c0_13 = arith.constant 0 : index
    %c640 = arith.constant 640 : index
    %25 = vector.load %arg5[%c0_13, %c640] : memref<16x768xf32, #tpu.memory_space<vmem>>, vector<16x128xf32>
    tpu.vector_store %arg5[%c0_13, %c640], %24 {strides = array<i32>} : memref<16x768xf32, #tpu.memory_space<vmem>>, vector<16x128xf32>,
    %c0_14 = arith.constant 0 : index
    %c128 = arith.constant 128 : index
    %26 = vector.load %arg5[%c0_14, %c128] : memref<16x768xf32, #tpu.memory_space<vmem>>, vector<16x512xf32>
    tpu.vector_store %arg5[%c0_14, %c128], %21 {strides = array<i32>} : memref<16x768xf32, #tpu.memory_space<vmem>>, vector<16x512xf32>,
    %cst_15 = arith.constant 0.000000e+00 : f32
    %27 = vector.broadcast %cst_15 : f32 to vector<16x512xf32>
    %c0_16 = arith.constant 0 : index
    %c111 = arith.constant 111 : index
    %28 = vector.load %arg5[%c0_16, %c111] : memref<16x768xf32, #tpu.memory_space<vmem>>, vector<16x512xf32>
    %c0_17 = arith.constant 0 : index
    %c32 = arith.constant 32 : index
    %29 = vector.load %arg3[%c0_17, %c32] : memref<48x128xf32, #tpu.memory_space<vmem>>, vector<16x1xf32>
    %c0_18 = arith.constant 0 : index
    %c0_19 = arith.constant 0 : index
    %30 = vector.load %arg2[%c0_18, %c0_19] : memref<9x512xf32, #tpu.memory_space<vmem>>, vector<1x512xf32>
    %31 = vector.broadcast %29 : vector<16x1xf32> to vector<16x512xf32>
    %32 = vector.broadcast %30 : vector<1x512xf32> to vector<16x512xf32>
    %33 = arith.mulf %31, %32 : vector<16x512xf32>
    %34 = arith.mulf %33, %28 : vector<16x512xf32>
    %35 = arith.addf %27, %34 : vector<16x512xf32>
    %c0_20 = arith.constant 0 : index
    %c112 = arith.constant 112 : index
    %36 = vector.load %arg5[%c0_20, %c112] : memref<16x768xf32, #tpu.memory_space<vmem>>, vector<16x512xf32>
    %c0_21 = arith.constant 0 : index
    %c33 = arith.constant 33 : index
    %37 = vector.load %arg3[%c0_21, %c33] : memref<48x128xf32, #tpu.memory_space<vmem>>, vector<16x1xf32>
    %c1 = arith.constant 1 : index
    %c0_22 = arith.constant 0 : index
    %38 = vector.load %arg2[%c1, %c0_22] : memref<9x512xf32, #tpu.memory_space<vmem>>, vector<1x512xf32>
    %39 = vector.broadcast %37 : vector<16x1xf32> to vector<16x512xf32>
    %40 = vector.broadcast %38 : vector<1x512xf32> to vector<16x512xf32>
    %41 = arith.mulf %39, %40 : vector<16x512xf32>
    %42 = arith.mulf %41, %36 : vector<16x512xf32>
    %43 = arith.addf %35, %42 : vector<16x512xf32>
    %c0_23 = arith.constant 0 : index
    %c113 = arith.constant 113 : index
    %44 = vector.load %arg5[%c0_23, %c113] : memref<16x768xf32, #tpu.memory_space<vmem>>, vector<16x512xf32>
    %c0_24 = arith.constant 0 : index
    %c34 = arith.constant 34 : index
    %45 = vector.load %arg3[%c0_24, %c34] : memref<48x128xf32, #tpu.memory_space<vmem>>, vector<16x1xf32>
    %c2 = arith.constant 2 : index
    %c0_25 = arith.constant 0 : index
    %46 = vector.load %arg2[%c2, %c0_25] : memref<9x512xf32, #tpu.memory_space<vmem>>, vector<1x512xf32>
    %47 = vector.broadcast %45 : vector<16x1xf32> to vector<16x512xf32>
    %48 = vector.broadcast %46 : vector<1x512xf32> to vector<16x512xf32>
    %49 = arith.mulf %47, %48 : vector<16x512xf32>
    %50 = arith.mulf %49, %44 : vector<16x512xf32>
    %51 = arith.addf %43, %50 : vector<16x512xf32>
    %c0_26 = arith.constant 0 : index
    %c127 = arith.constant 127 : index
    %52 = vector.load %arg5[%c0_26, %c127] : memref<16x768xf32, #tpu.memory_space<vmem>>, vector<16x512xf32>
    %c0_27 = arith.constant 0 : index
    %c35 = arith.constant 35 : index
    %53 = vector.load %arg3[%c0_27, %c35] : memref<48x128xf32, #tpu.memory_space<vmem>>, vector<16x1xf32>
    %c3 = arith.constant 3 : index
    %c0_28 = arith.constant 0 : index
    %54 = vector.load %arg2[%c3, %c0_28] : memref<9x512xf32, #tpu.memory_space<vmem>>, vector<1x512xf32>
    %55 = vector.broadcast %53 : vector<16x1xf32> to vector<16x512xf32>
    %56 = vector.broadcast %54 : vector<1x512xf32> to vector<16x512xf32>
    %57 = arith.mulf %55, %56 : vector<16x512xf32>
    %58 = arith.mulf %57, %52 : vector<16x512xf32>
    %59 = arith.addf %51, %58 : vector<16x512xf32>
    %c0_29 = arith.constant 0 : index
    %c128_30 = arith.constant 128 : index
    %60 = vector.load %arg5[%c0_29, %c128_30] : memref<16x768xf32, #tpu.memory_space<vmem>>, vector<16x512xf32>
    %c0_31 = arith.constant 0 : index
    %c36 = arith.constant 36 : index
    %61 = vector.load %arg3[%c0_31, %c36] : memref<48x128xf32, #tpu.memory_space<vmem>>, vector<16x1xf32>
    %c4 = arith.constant 4 : index
    %c0_32 = arith.constant 0 : index
    %62 = vector.load %arg2[%c4, %c0_32] : memref<9x512xf32, #tpu.memory_space<vmem>>, vector<1x512xf32>
    %63 = vector.broadcast %61 : vector<16x1xf32> to vector<16x512xf32>
    %64 = vector.broadcast %62 : vector<1x512xf32> to vector<16x512xf32>
    %65 = arith.mulf %63, %64 : vector<16x512xf32>
    %66 = arith.mulf %65, %60 : vector<16x512xf32>
    %67 = arith.addf %59, %66 : vector<16x512xf32>
    %c0_33 = arith.constant 0 : index
    %c129 = arith.constant 129 : index
    %68 = vector.load %arg5[%c0_33, %c129] : memref<16x768xf32, #tpu.memory_space<vmem>>, vector<16x512xf32>
    %c0_34 = arith.constant 0 : index
    %c37 = arith.constant 37 : index
    %69 = vector.load %arg3[%c0_34, %c37] : memref<48x128xf32, #tpu.memory_space<vmem>>, vector<16x1xf32>
    %c5 = arith.constant 5 : index
    %c0_35 = arith.constant 0 : index
    %70 = vector.load %arg2[%c5, %c0_35] : memref<9x512xf32, #tpu.memory_space<vmem>>, vector<1x512xf32>
    %71 = vector.broadcast %69 : vector<16x1xf32> to vector<16x512xf32>
    %72 = vector.broadcast %70 : vector<1x512xf32> to vector<16x512xf32>
    %73 = arith.mulf %71, %72 : vector<16x512xf32>
    %74 = arith.mulf %73, %68 : vector<16x512xf32>
    %75 = arith.addf %67, %74 : vector<16x512xf32>
    %c0_36 = arith.constant 0 : index
    %c143 = arith.constant 143 : index
    %76 = vector.load %arg5[%c0_36, %c143] : memref<16x768xf32, #tpu.memory_space<vmem>>, vector<16x512xf32>
    %c0_37 = arith.constant 0 : index
    %c38 = arith.constant 38 : index
    %77 = vector.load %arg3[%c0_37, %c38] : memref<48x128xf32, #tpu.memory_space<vmem>>, vector<16x1xf32>
    %c6 = arith.constant 6 : index
    %c0_38 = arith.constant 0 : index
    %78 = vector.load %arg2[%c6, %c0_38] : memref<9x512xf32, #tpu.memory_space<vmem>>, vector<1x512xf32>
    %79 = vector.broadcast %77 : vector<16x1xf32> to vector<16x512xf32>
    %80 = vector.broadcast %78 : vector<1x512xf32> to vector<16x512xf32>
    %81 = arith.mulf %79, %80 : vector<16x512xf32>
    %82 = arith.mulf %81, %76 : vector<16x512xf32>
    %83 = arith.addf %75, %82 : vector<16x512xf32>
    %c0_39 = arith.constant 0 : index
    %c144 = arith.constant 144 : index
    %84 = vector.load %arg5[%c0_39, %c144] : memref<16x768xf32, #tpu.memory_space<vmem>>, vector<16x512xf32>
    %c0_40 = arith.constant 0 : index
    %c39 = arith.constant 39 : index
    %85 = vector.load %arg3[%c0_40, %c39] : memref<48x128xf32, #tpu.memory_space<vmem>>, vector<16x1xf32>
    %c7 = arith.constant 7 : index
    %c0_41 = arith.constant 0 : index
    %86 = vector.load %arg2[%c7, %c0_41] : memref<9x512xf32, #tpu.memory_space<vmem>>, vector<1x512xf32>
    %87 = vector.broadcast %85 : vector<16x1xf32> to vector<16x512xf32>
    %88 = vector.broadcast %86 : vector<1x512xf32> to vector<16x512xf32>
    %89 = arith.mulf %87, %88 : vector<16x512xf32>
    %90 = arith.mulf %89, %84 : vector<16x512xf32>
    %91 = arith.addf %83, %90 : vector<16x512xf32>
    %c0_42 = arith.constant 0 : index
    %c145 = arith.constant 145 : index
    %92 = vector.load %arg5[%c0_42, %c145] : memref<16x768xf32, #tpu.memory_space<vmem>>, vector<16x512xf32>
    %c0_43 = arith.constant 0 : index
    %c40 = arith.constant 40 : index
    %93 = vector.load %arg3[%c0_43, %c40] : memref<48x128xf32, #tpu.memory_space<vmem>>, vector<16x1xf32>
    %c8 = arith.constant 8 : index
    %c0_44 = arith.constant 0 : index
    %94 = vector.load %arg2[%c8, %c0_44] : memref<9x512xf32, #tpu.memory_space<vmem>>, vector<1x512xf32>
    %95 = vector.broadcast %93 : vector<16x1xf32> to vector<16x512xf32>
    %96 = vector.broadcast %94 : vector<1x512xf32> to vector<16x512xf32>
    %97 = arith.mulf %95, %96 : vector<16x512xf32>
    %98 = arith.mulf %97, %92 : vector<16x512xf32>
    %99 = arith.addf %91, %98 : vector<16x512xf32>
    %100 = arith.truncf %99 : vector<16x512xf32> to vector<16x512xbf16>
    %c0_45 = arith.constant 0 : index
    %c128_46 = arith.constant 128 : index
    %101 = vector.load %arg1[%c0_45, %c128_46] : memref<512x256xbf16, #tpu.memory_space<vmem>>, vector<512x128xbf16>
    %cst_47 = arith.constant dense<0.000000e+00> : vector<16x128xf32>
    %102 = tpu.matmul %100, %101, %cst_47 {dimension_numbers = #tpu.dot_dimension_numbers<[1], [0], [0], [1], [0, 0, 1, 1], [], []>} : vector<16x512xbf16>, vector<512x128xbf16>, vector<16x128xf32> -> vector<16x128xf32>
    %103 = arith.truncf %16 : vector<16x512xf32> to vector<16x512xbf16>
    %c0_48 = arith.constant 0 : index
    %c0_49 = arith.constant 0 : index
    %104 = vector.load %arg1[%c0_48, %c0_49] : memref<512x256xbf16, #tpu.memory_space<vmem>>, vector<512x128xbf16>
    %cst_50 = arith.constant dense<0.000000e+00> : vector<16x128xf32>
    %105 = tpu.matmul %103, %104, %cst_50 {dimension_numbers = #tpu.dot_dimension_numbers<[1], [0], [0], [1], [0, 0, 1, 1], [], []>} : vector<16x512xbf16>, vector<512x128xbf16>, vector<16x128xf32> -> vector<16x128xf32>
    %c0_51 = arith.constant 0 : index
    %c16 = arith.constant 16 : index
    %106 = vector.load %arg3[%c0_51, %c16] : memref<48x128xf32, #tpu.memory_space<vmem>>, vector<16x16xf32>
    %cst_52 = arith.constant dense<0.000000e+00> : vector<16x128xf32>
    %107 = tpu.matmul %106, %105, %cst_52 {dimension_numbers = #tpu.dot_dimension_numbers<[1], [0], [0], [1], [0, 0, 1, 1], [], []>} : vector<16x16xf32>, vector<16x128xf32>, vector<16x128xf32> -> vector<16x128xf32>
    %c0_53 = arith.constant 0 : index
    %c81 = arith.constant 81 : index
    %108 = vector.load %arg3[%c0_53, %c81] : memref<48x128xf32, #tpu.memory_space<vmem>>, vector<16x1xf32>
    %109 = vector.broadcast %108 : vector<16x1xf32> to vector<16x128xf32>
    %110 = arith.addf %107, %109 : vector<16x128xf32>
    %111 = arith.addf %102, %110 : vector<16x128xf32>
    %112 = tpu.iota {dimensions = array<i32: 1>} : vector<1x128xi32>
    %c64_i32 = arith.constant 64 : i32
    %113 = vector.broadcast %c64_i32 : i32 to vector<1x128xi32>
    %114 = arith.cmpi sge, %112, %113 : vector<1x128xi32>
    %cst_54 = arith.constant 0.000000e+00 : f32
    %115 = vector.shape_cast %114 : vector<1x128xi1> to vector<1x128xi1>
    %116 = vector.broadcast %115 : vector<1x128xi1> to vector<16x128xi1>
    %117 = vector.broadcast %cst_54 : f32 to vector<16x128xf32>
    %118 = arith.select %116, %117, %111 : vector<16x128xi1>, vector<16x128xf32>
    %cst_55 = arith.constant dense<0.000000e+00> : vector<16xf32>
    %119 = vector.multi_reduction <add>, %118, %cst_55 [1] : vector<16x128xf32> to vector<16xf32>
    %120 = vector.shape_cast %119 : vector<16xf32> to vector<16x1xf32>
    %cst_56 = arith.constant 0.000000e+00 : f32
    %121 = vector.shape_cast %114 : vector<1x128xi1> to vector<1x128xi1>
    %122 = vector.broadcast %121 : vector<1x128xi1> to vector<16x128xi1>
    %123 = vector.broadcast %cst_56 : f32 to vector<16x128xf32>
    %124 = arith.select %122, %111, %123 : vector<16x128xi1>, vector<16x128xf32>
    %cst_57 = arith.constant dense<0.000000e+00> : vector<16xf32>
    %125 = vector.multi_reduction <add>, %124, %cst_57 [1] : vector<16x128xf32> to vector<16xf32>
    %126 = vector.shape_cast %125 : vector<16xf32> to vector<16x1xf32>
    %127 = tpu.iota {dimensions = array<i32: 1>} : vector<16x2xi32>
    %c0_i32 = arith.constant 0 : i32
    %128 = vector.broadcast %c0_i32 : i32 to vector<16x2xi32>
    %129 = arith.cmpi eq, %127, %128 : vector<16x2xi32>
    %130 = vector.shape_cast %120 : vector<16x1xf32> to vector<16x1xf32>
    %131 = vector.broadcast %130 : vector<16x1xf32> to vector<16x2xf32>
    %132 = vector.shape_cast %126 : vector<16x1xf32> to vector<16x1xf32>
    %133 = vector.broadcast %132 : vector<16x1xf32> to vector<16x2xf32>
    %134 = arith.select %129, %131, %133 : vector<16x2xi1>, vector<16x2xf32>
    %cst_58 = arith.constant 1.562500e-02 : f32
    %135 = vector.broadcast %cst_58 : f32 to vector<16x2xf32>
    %136 = arith.mulf %134, %135 : vector<16x2xf32>
    %c0_59 = arith.constant 0 : index
    %c96 = arith.constant 96 : index
    %137 = vector.load %arg3[%c0_59, %c96] : memref<48x128xf32, #tpu.memory_space<vmem>>, vector<4x16xf32>
    %cst_60 = arith.constant dense<0.000000e+00> : vector<4x2xf32>
    %138 = tpu.matmul %137, %136, %cst_60 {dimension_numbers = #tpu.dot_dimension_numbers<[1], [0], [0], [1], [0, 0, 1, 1], [], []>} : vector<4x16xf32>, vector<16x2xf32>, vector<4x2xf32> -> vector<4x2xf32>
    %c0_61 = arith.constant 0 : index
    %c112_62 = arith.constant 112 : index
    %139 = vector.load %arg3[%c0_61, %c112_62] : memref<48x128xf32, #tpu.memory_space<vmem>>, vector<4x1xf32>
    %140 = vector.broadcast %139 : vector<4x1xf32> to vector<4x2xf32>
    %141 = arith.addf %138, %140 : vector<4x2xf32>
    %cst_63 = arith.constant 5.000000e-01 : f32
    %142 = vector.broadcast %cst_63 : f32 to vector<4x2xf32>
    %143 = arith.mulf %142, %141 : vector<4x2xf32>
    %cst_64 = arith.constant 4.471500e-02 : f32
    %144 = vector.broadcast %cst_64 : f32 to vector<4x2xf32>
    %145 = arith.mulf %144, %141 : vector<4x2xf32>
    %146 = arith.mulf %145, %141 : vector<4x2xf32>
    %147 = arith.mulf %146, %141 : vector<4x2xf32>
    %148 = arith.addf %141, %147 : vector<4x2xf32>
    %cst_65 = arith.constant 0.797884583 : f32
    %149 = vector.broadcast %cst_65 : f32 to vector<4x2xf32>
    %150 = arith.mulf %149, %148 : vector<4x2xf32>
    %151 = math.tanh %150 : vector<4x2xf32>
    %cst_66 = arith.constant 1.000000e+00 : f32
    %152 = vector.broadcast %cst_66 : f32 to vector<4x2xf32>
    %153 = arith.addf %152, %151 : vector<4x2xf32>
    %154 = arith.mulf %143, %153 : vector<4x2xf32>
    %c16_67 = arith.constant 16 : index
    %c32_68 = arith.constant 32 : index
    %155 = vector.load %arg3[%c16_67, %c32_68] : memref<48x128xf32, #tpu.memory_space<vmem>>, vector<32x4xf32>
    %cst_69 = arith.constant dense<0.000000e+00> : vector<32x2xf32>
    %156 = tpu.matmul %155, %154, %cst_69 {dimension_numbers = #tpu.dot_dimension_numbers<[1], [0], [0], [1], [0, 0, 1, 1], [], []>} : vector<32x4xf32>, vector<4x2xf32>, vector<32x2xf32> -> vector<32x2xf32>
    %c16_70 = arith.constant 16 : index
    %c36_71 = arith.constant 36 : index
    %157 = vector.load %arg3[%c16_70, %c36_71] : memref<48x128xf32, #tpu.memory_space<vmem>>, vector<32x1xf32>
    %158 = vector.broadcast %157 : vector<32x1xf32> to vector<32x2xf32>
    %159 = arith.addf %156, %158 : vector<32x2xf32>
    %160 = vector.extract_strided_slice %159 {offsets = [0, 0], sizes = [16, 2], strides = [1, 1]} : vector<32x2xf32> to vector<16x2xf32>
    %161 = vector.extract_strided_slice %159 {offsets = [16, 0], sizes = [16, 2], strides = [1, 1]} : vector<32x2xf32> to vector<16x2xf32>
    %162 = arith.maximumf %160, %161 : vector<16x2xf32>
    %163 = arith.subf %160, %162 : vector<16x2xf32>
    %164 = math.exp %163 : vector<16x2xf32>
    %165 = arith.subf %161, %162 : vector<16x2xf32>
    %166 = math.exp %165 : vector<16x2xf32>
    %167 = arith.addf %164, %166 : vector<16x2xf32>
    %168 = tpu.reciprocal %167 {approx = true} : vector<16x2xf32> -> vector<16x2xf32>
    %169 = arith.mulf %164, %168 : vector<16x2xf32>
    %170 = arith.mulf %166, %168 : vector<16x2xf32>
    %171 = vector.extract_strided_slice %169 {offsets = [0, 1], sizes = [16, 1], strides = [1, 1]} : vector<16x2xf32> to vector<16x1xf32>
    %172 = vector.extract_strided_slice %169 {offsets = [0, 0], sizes = [16, 1], strides = [1, 1]} : vector<16x2xf32> to vector<16x1xf32>
    %173 = vector.shape_cast %114 : vector<1x128xi1> to vector<1x128xi1>
    %174 = vector.broadcast %173 : vector<1x128xi1> to vector<16x128xi1>
    %175 = vector.shape_cast %171 : vector<16x1xf32> to vector<16x1xf32>
    %176 = vector.broadcast %175 : vector<16x1xf32> to vector<16x128xf32>
    %177 = vector.shape_cast %172 : vector<16x1xf32> to vector<16x1xf32>
    %178 = vector.broadcast %177 : vector<16x1xf32> to vector<16x128xf32>
    %179 = arith.select %174, %176, %178 : vector<16x128xi1>, vector<16x128xf32>
    %180 = vector.extract_strided_slice %170 {offsets = [0, 1], sizes = [16, 1], strides = [1, 1]} : vector<16x2xf32> to vector<16x1xf32>
    %181 = vector.extract_strided_slice %170 {offsets = [0, 0], sizes = [16, 1], strides = [1, 1]} : vector<16x2xf32> to vector<16x1xf32>
    %182 = vector.shape_cast %114 : vector<1x128xi1> to vector<1x128xi1>
    %183 = vector.broadcast %182 : vector<1x128xi1> to vector<16x128xi1>
    %184 = vector.shape_cast %180 : vector<16x1xf32> to vector<16x1xf32>
    %185 = vector.broadcast %184 : vector<16x1xf32> to vector<16x128xf32>
    %186 = vector.shape_cast %181 : vector<16x1xf32> to vector<16x1xf32>
    %187 = vector.broadcast %186 : vector<16x1xf32> to vector<16x128xf32>
    %188 = arith.select %183, %185, %187 : vector<16x128xi1>, vector<16x128xf32>
    %189 = arith.mulf %179, %102 : vector<16x128xf32>
    %190 = arith.mulf %188, %110 : vector<16x128xf32>
    %191 = arith.addf %189, %190 : vector<16x128xf32>
    %cst_72 = arith.constant dense<0.000000e+00> : vector<128xf32>
    %192 = vector.multi_reduction <add>, %191, %cst_72 [0] : vector<16x128xf32> to vector<128xf32>
    %193 = vector.shape_cast %192 : vector<128xf32> to vector<1x128xf32>
    %cst_73 = arith.constant 1.600000e+01 : f32
    %194 = vector.broadcast %cst_73 : f32 to vector<1x128xf32>
    %195 = arith.divf %193, %194 : vector<1x128xf32>
    %196 = vector.broadcast %195 : vector<1x128xf32> to vector<16x128xf32>
    %197 = arith.subf %191, %196 : vector<16x128xf32>
    %198 = arith.mulf %197, %197 : vector<16x128xf32>
    %cst_74 = arith.constant dense<0.000000e+00> : vector<128xf32>
    %199 = vector.multi_reduction <add>, %198, %cst_74 [0] : vector<16x128xf32> to vector<128xf32>
    %200 = vector.shape_cast %199 : vector<128xf32> to vector<1x128xf32>
    %cst_75 = arith.constant 1.600000e+01 : f32
    %201 = vector.broadcast %cst_75 : f32 to vector<1x128xf32>
    %202 = arith.divf %200, %201 : vector<1x128xf32>
    %cst_76 = arith.constant 9.99999997E-7 : f32
    %203 = vector.broadcast %cst_76 : f32 to vector<1x128xf32>
    %204 = arith.addf %202, %203 : vector<1x128xf32>
    %205 = math.rsqrt %204 : vector<1x128xf32>
    %206 = vector.broadcast %205 : vector<1x128xf32> to vector<16x128xf32>
    %207 = arith.mulf %197, %206 : vector<16x128xf32>
    %c16_77 = arith.constant 16 : index
    %c0_78 = arith.constant 0 : index
    %208 = vector.load %arg3[%c16_77, %c0_78] : memref<48x128xf32, #tpu.memory_space<vmem>>, vector<32x16xf32>
    %cst_79 = arith.constant dense<0.000000e+00> : vector<32x128xf32>
    %209 = tpu.matmul %208, %207, %cst_79 {dimension_numbers = #tpu.dot_dimension_numbers<[1], [0], [0], [1], [0, 0, 1, 1], [], []>} : vector<32x16xf32>, vector<16x128xf32>, vector<32x128xf32> -> vector<32x128xf32>
    %c16_80 = arith.constant 16 : index
    %c16_81 = arith.constant 16 : index
    %210 = vector.load %arg3[%c16_80, %c16_81] : memref<48x128xf32, #tpu.memory_space<vmem>>, vector<32x1xf32>
    %211 = vector.broadcast %210 : vector<32x1xf32> to vector<32x128xf32>
    %212 = arith.addf %209, %211 : vector<32x128xf32>
    %cst_82 = arith.constant 5.000000e-01 : f32
    %213 = vector.broadcast %cst_82 : f32 to vector<32x128xf32>
    %214 = arith.mulf %213, %212 : vector<32x128xf32>
    %cst_83 = arith.constant 4.471500e-02 : f32
    %215 = vector.broadcast %cst_83 : f32 to vector<32x128xf32>
    %216 = arith.mulf %215, %212 : vector<32x128xf32>
    %217 = arith.mulf %216, %212 : vector<32x128xf32>
    %218 = arith.mulf %217, %212 : vector<32x128xf32>
    %219 = arith.addf %212, %218 : vector<32x128xf32>
    %cst_84 = arith.constant 0.797884583 : f32
    %220 = vector.broadcast %cst_84 : f32 to vector<32x128xf32>
    %221 = arith.mulf %220, %219 : vector<32x128xf32>
    %222 = math.tanh %221 : vector<32x128xf32>
    %cst_85 = arith.constant 1.000000e+00 : f32
    %223 = vector.broadcast %cst_85 : f32 to vector<32x128xf32>
    %224 = arith.addf %223, %222 : vector<32x128xf32>
    %225 = arith.mulf %214, %224 : vector<32x128xf32>
    %c0_86 = arith.constant 0 : index
    %c48 = arith.constant 48 : index
    %226 = vector.load %arg3[%c0_86, %c48] : memref<48x128xf32, #tpu.memory_space<vmem>>, vector<16x32xf32>
    %cst_87 = arith.constant dense<0.000000e+00> : vector<16x128xf32>
    %227 = tpu.matmul %226, %225, %cst_87 {dimension_numbers = #tpu.dot_dimension_numbers<[1], [0], [0], [1], [0, 0, 1, 1], [], []>} : vector<16x32xf32>, vector<32x128xf32>, vector<16x128xf32> -> vector<16x128xf32>
    %c0_88 = arith.constant 0 : index
    %c82 = arith.constant 82 : index
    %228 = vector.load %arg3[%c0_88, %c82] : memref<48x128xf32, #tpu.memory_space<vmem>>, vector<16x1xf32>
    %229 = vector.broadcast %228 : vector<16x1xf32> to vector<16x128xf32>
    %230 = arith.addf %227, %229 : vector<16x128xf32>
    %231 = arith.addf %191, %230 : vector<16x128xf32>
    %c0_89 = arith.constant 0 : index
    %c0_90 = arith.constant 0 : index
    %232 = vector.load %arg4[%c0_89, %c0_90] : memref<16x128xf32, #tpu.memory_space<vmem>>, vector<16x128xf32>
    tpu.vector_store %arg4[%c0_89, %c0_90], %231 {strides = array<i32>} : memref<16x128xf32, #tpu.memory_space<vmem>>, vector<16x128xf32>,
    return
  }
}

</mosaic_0001>

<bundles_post_ra>
// kernel: gcm_pallas.1
= control target key start
LH: loop header
LB: loop body
LE: loop exit
PB: predicated region body
PF: predicated region fallthrough
CT: control target
= control target key end

     0   :  { %v4367_v3 = vmov 0.0   ;;  %v2967_v8 = vmov 32   ;;  %v2968_v9 = vmov 80   ;;  %v2969_v34 = vmov 33   ;;  %s2978_s9 = smov 16   ;;  %s2979_s10 = smov 127   ;;  %s4362_s0 = inlined_call_operand.vmem [shape: f32[16,512], index: 0, kind: input, shape index: {}]   ;;  %s4363_s3 = inlined_call_operand.vmem [shape: f32[48,128], index: 3, kind: input, shape index: {}]   ;;  %s4364_s1 = inlined_call_operand.vmem [shape: bf16[512,256], index: 1, kind: input, shape index: {}]   ;;  %s4365_s2 = inlined_call_operand.vmem [shape: f32[9,512], index: 2, kind: input, shape index: {}]   ;;  %s4366_s4 = inlined_call_operand.vmem [shape: f32[16,128], index: 4, kind: output, shape index: {}]  }
   0x1   :  { %v19_v0 = vld [vmem:[%s4362_s0 + $0x8] sm:$0xff]  ;;  %v3030_v2 = vld [vmem:[%s4362_s0 + $0x18] sm:$0xff]  ;;  %204 = vmatprep.mubr.f32.mxu0 %v4367_v3  ;;  %281 = vmatprep.mubr.f32.mxu1 %v4367_v3  ;;  %v18_v6 = vld [vmem:[%s4362_s0] sm:$0xff]  ;;  %v2970_v45 = vmov 34   ;;  %s2980_s11 = smov 112   ;;  %s2981_s12 = smov 15  }
   0x2   :  { %v23_v1 = vld [vmem:[%s4362_s0 + $0x28] sm:$0xff]  ;;  %v25_v5 = vld [vmem:[%s4362_s0 + $0x38] sm:$0xff]  ;;  %v22_v7 = vld [vmem:[%s4362_s0 + $0x20] sm:$0xff]  ;;  %2797 = vset.pattern.permute.xlu1 %v2967_v8  ;;  %2796 = vset.pattern.permute.xlu0 %v2968_v9  ;;  %vm135_vm0 = vcmask 130048   ;;  %s2982_s13 = smov 1   ;;  %s2983_s14 = smov 113  }
   0x3   :  { %v33_v4 = vadd.f32 %v23_v1, %v19_v0  ;;  %v47_v10 = vadd.f32 %v25_v5, %v3030_v2  ;;  %v26_v11 = vadd.f32 %v22_v7, %v18_v6  ;;  %v20_v12 = vld [vmem:[%s4362_s0 + $0x10] sm:$0xff]  ;;  %v3053_v14 = vld [vmem:[%s4363_s3] sm:$0xff]  ;;  %v3060_v23 = vld [vmem:[%s4363_s3 + $0x8] sm:$0xff]  ;;  %s2984_s15 = smov 111   ;;  %vm388_vm1 = vcmask 138240   ;;  %s2990_s19 = smov 96  }
   0x4   :  { %v24_v13 = vld [vmem:[%s4362_s0 + $0x30] sm:$0xff]  ;;  %321 = vperm.xlu1 %2797, %v3053_v14   ;;  %127 = vperm.xlu0 %2796, %v3053_v14   ;;  %s2976_s0 = smov 17   ;;  %vm571_vm2 = vcmask 121856   ;;  %vm663_vm3 = vcmask 7168   ;;  %vm830_vm4 = vcmask 1039360   ;;  %vm922_vm5 = vcmask 924672  }
   0x5   :  { %v34_v15 = vrot.slane %v33_v4, 4  ;;  %v40_v16 = vadd.f32 %v24_v13, %v20_v12  ;;  %v48_v17 = vrot.slane %v47_v10, 4  ;;  %v27_v18 = vrot.slane %v26_v11, 4 }
   0x6   :  { %vm1014_vm6 = vcmask 916480   ;;  %vm1106_vm7 = vcmask 908288   ;;  %vm2988_vm9 = vmmov 0   ;;  %vm2059_vm11 = vcmask 31744  }
   0x7   :  { %v35_v19 = vadd.f32 %v34_v15, %v33_v4  ;;  %v41_v20 = vrot.slane %v40_v16, 4  ;;  %v49_v21 = vadd.f32 %v48_v17, %v47_v10  ;;  %v28_v22 = vadd.f32 %v27_v18, %v26_v11 }
   0x8   :  { %326 = vperm.xlu1 %2797, %v3060_v23   ;;  %132 = vperm.xlu0 %2796, %v3060_v23   ;;  %vm2068_vm12 = vcmask 1043456   ;;  %vm2406_vm13 = vcmask 261120  }
   0x9   :  { %v36_v24 = vrot.slane %v35_v19, 2  ;;  %v42_v25 = vadd.f32 %v41_v20, %v40_v16  ;;  %v50_v26 = vrot.slane %v49_v21, 2  ;;  %v29_v27 = vrot.slane %v28_v22, 2 }
   0xb   :  { %v37_v28 = vadd.f32 %v36_v24, %v35_v19  ;;  %v43_v29 = vrot.slane %v42_v25, 2  ;;  %v51_v30 = vadd.f32 %v50_v26, %v49_v21  ;;  %v30_v31 = vadd.f32 %v29_v27, %v28_v22 }
   0xc   :  { %2799 = vset.pattern.permute.xlu1 %v2969_v34  ;;  %2798 = vset.pattern.permute.xlu0 %v2969_v34  ;;  %v2974_v26 = vmov 38  }
   0xd   :  { %v38_v32 = vrot.slane %v37_v28, 1  ;;  %v44_v33 = vadd.f32 %v43_v29, %v42_v25  ;;  %v52_v35 = vrot.slane %v51_v30, 1  ;;  %v31_v36 = vrot.slane %v30_v31, 1  ;;  %428 = vperm.xlu1 %2799, %v3060_v23   ;;  %424 = vperm.xlu0 %2798, %v3053_v14  }
   0xf   :  { %v39_v37 = vadd.f32 %v38_v32, %v37_v28  ;;  %v45_v38 = vrot.slane %v44_v33, 1  ;;  %v53_v39 = vadd.f32 %v52_v35, %v51_v30  ;;  %v32_v40 = vadd.f32 %v31_v36, %v30_v31 }
  0x11   :  { %v56_v41 = vmul.f32 0.0625, %v39_v37  ;;  %v46_v42 = vadd.f32 %v45_v38, %v44_v33  ;;  %v58_v43 = vmul.f32 0.0625, %v53_v39  ;;  %v55_v44 = vmul.f32 0.0625, %v32_v40  ;;  %2800 = vset.pattern.permute.xlu1 %v2970_v45  ;;  %2801 = vset.pattern.permute.xlu0 %v2970_v45 }
  0x12   :  { %515 = vperm.xlu1 %2800, %v3053_v14   ;;  %519 = vperm.xlu0 %2801, %v3060_v23   ;;  %v2975_v37 = vmov 39  }
  0x13   :  { %v3066_v46 = vsub.f32 %v19_v0, %v56_v41  ;;  %v3068_v47 = vsub.f32 %v23_v1, %v56_v41  ;;  %v57_v48 = vmul.f32 0.0625, %v46_v42  ;;  %v3073_v49 = vsub.f32 %v3030_v2, %v58_v43 }
  0x14   :  { %v3075_v50 = vsub.f32 %v25_v5, %v58_v43  ;;  %v3077_v51 = vsub.f32 %v18_v6, %v55_v44  ;;  %v3079_v52 = vsub.f32 %v22_v7, %v55_v44  ;;  %v2971_v0 = vmov 35  }
  0x15   :  { %v68_v53 = vmul.f32 %v3066_v46, %v3066_v46  ;;  %v72_v54 = vmul.f32 %v3068_v47, %v3068_v47  ;;  %v3085_v55 = vsub.f32 %v20_v12, %v57_v48  ;;  %v3087_v56 = vsub.f32 %v24_v13, %v57_v48 }
  0x16   :  { %v70_v57 = vmul.f32 %v3073_v49, %v3073_v49  ;;  %v74_v58 = vmul.f32 %v3075_v50, %v3075_v50  ;;  %v67_v59 = vmul.f32 %v3077_v51, %v3077_v51  ;;  %v71_v60 = vmul.f32 %v3079_v52, %v3079_v52  ;;  %2802 = vset.pattern.permute.xlu1 %v2971_v0 }
  0x17   :  { %v82_v61 = vadd.f32 %v72_v54, %v68_v53  ;;  %v69_v62 = vmul.f32 %v3085_v55, %v3085_v55  ;;  %v73_v63 = vmul.f32 %v3087_v56, %v3087_v56  ;;  %v4369_v1 = vmov 36   ;;  %607 = vperm.xlu1 %2802, %v3053_v14  }
  0x18   :  { %2803 = vset.pattern.permute.xlu0 %v4369_v1  ;;  %v96_v2 = vadd.f32 %v74_v58, %v70_v57  ;;  %v75_v4 = vadd.f32 %v71_v60, %v67_v59  ;;  %v2973_v13 = vmov 37   ;;  %v2977_v43 = vmov 40  }
  0x19   :  { %699 = vperm.xlu0 %2803, %v3053_v14   ;;  %v83_v5 = vrot.slane %v82_v61, 4  ;;  %v89_v6 = vadd.f32 %v73_v63, %v69_v62 }
  0x1a   :  { %v97_v7 = vrot.slane %v96_v2, 4  ;;  %v76_v8 = vrot.slane %v75_v4, 4 }
  0x1b   :  { %v84_v9 = vadd.f32 %v83_v5, %v82_v61  ;;  %v90_v10 = vrot.slane %v89_v6, 4  ;;  %611 = vperm.xlu1 %2802, %v3060_v23  }
  0x1c   :  { %v98_v11 = vadd.f32 %v97_v7, %v96_v2  ;;  %v77_v12 = vadd.f32 %v76_v8, %v75_v4 }
  0x1d   :  { %2806 = vset.pattern.permute.xlu0 %v2973_v13  ;;  %v85_v15 = vrot.slane %v84_v9, 2  ;;  %v91_v16 = vadd.f32 %v90_v10, %v89_v6 }
  0x1e   :  { %768 = vperm.xlu0 %2806, %v3060_v23   ;;  %v99_v17 = vrot.slane %v98_v11, 2  ;;  %v78_v18 = vrot.slane %v77_v12, 2 }
  0x1f   :  { %v86_v19 = vadd.f32 %v85_v15, %v84_v9  ;;  %v92_v20 = vrot.slane %v91_v16, 2  ;;  %2804 = vset.pattern.permute.xlu1 %v4369_v1 }
  0x20   :  { %v100_v21 = vadd.f32 %v99_v17, %v98_v11  ;;  %v79_v22 = vadd.f32 %v78_v18, %v77_v12  ;;  %703 = vperm.xlu1 %2804, %v3060_v23  }
  0x21   :  { %v87_v24 = vrot.slane %v86_v19, 1  ;;  %v93_v25 = vadd.f32 %v92_v20, %v91_v16 }
  0x22   :  { %2817 = vset.pattern.permute.xlu0 %v2974_v26  ;;  %v101_v27 = vrot.slane %v100_v21, 1  ;;  %v80_v28 = vrot.slane %v79_v22, 1 }
  0x23   :  { %866 = vperm.xlu0 %2817, %v3053_v14   ;;  %v88_v29 = vadd.f32 %v87_v24, %v86_v19  ;;  %v94_v30 = vrot.slane %v93_v25, 1 }
  0x24   :  { %v102_v31 = vadd.f32 %v101_v27, %v100_v21  ;;  %v81_v32 = vadd.f32 %v80_v28, %v79_v22  ;;  %2805 = vset.pattern.permute.xlu1 %v2973_v13 }
  0x25   :  { %v104_v33 = vmul.f32 0.0625, %v88_v29  ;;  %v95_v34 = vadd.f32 %v94_v30, %v93_v25  ;;  %764 = vperm.xlu1 %2805, %v3053_v14  }
  0x26   :  { %v106_v35 = vmul.f32 0.0625, %v102_v31  ;;  %v103_v36 = vmul.f32 0.0625, %v81_v32 }
  0x27   :  { %2824 = vset.pattern.permute.xlu0 %v2975_v37  ;;  %v108_v38 = vadd.f32 1e-06, %v104_v33  ;;  %v105_v39 = vmul.f32 0.0625, %v95_v34  ;;  %v2868_v33 = vld [vmem:[%s4364_s1 + $0x184] ss:$8 sps:$4 sm:$0xff]  }
  0x28   :  { %958 = vperm.xlu0 %2824, %v3053_v14   ;;  %v110_v40 = vadd.f32 1e-06, %v106_v35  ;;  %v107_v41 = vadd.f32 1e-06, %v103_v36  ;;  %v2869_v35 = vld [vmem:[%s4364_s1 + $0x84] ss:$8 sps:$4 sm:$0xff]  }
  0x29   :  { %2932 = vrsqrt.f32 %v108_v38  ;;  %v109_v42 = vadd.f32 1e-06, %v105_v39  ;;  %2808 = vrot.lane.b32.xlu1 %v4367_v3, %s2976_s0  ;;  %v2870_v36 = vld [vmem:[%s4364_s1 + $0x104] ss:$8 sps:$4 sm:$0xff]   ;;  %v2872_v38 = vld [vmem:[%s4364_s1 + $0x194] ss:$8 sps:$4 sm:$0xff]  }
  0x2a   :  { %2934 = vrsqrt.f32 %v110_v40  ;;  %2818 = vset.pattern.permute.xlu1 %v2974_v26 }
  0x2b   :  { %2936 = vrsqrt.f32 %v107_v41  ;;  %v2873_v41 = vld [vmem:[%s4364_s1 + $0x94] ss:$8 sps:$4 sm:$0xff]  }
  0x2c   :  { %2831 = vset.pattern.permute.xlu0 %v2977_v43  ;;  %2938 = vrsqrt.f32 %v109_v42  ;;  %v2874_v42 = vld [vmem:[%s4364_s1 + $0x114] ss:$8 sps:$4 sm:$0xff]  }
  0x2d   :  { %1050 = vperm.xlu0 %2831, %v3053_v14   ;;  %2813 = vrot.lane.b32.xlu1 %v4367_v3, %s2978_s9 }
  0x31   :  { %2834 = vrot.lane.b32.xlu0 %v4367_v3, %s2979_s10  ;;  %870 = vperm.xlu1 %2818, %v3060_v23  }
  0x33   :  { %v2933_v44 = vpop.eup %2932 }
  0x34   :  { %v2935_v45 = vpop.eup %2934  ;;  %v116_v48 = vmul.f32 %v2933_v44, %v3066_v46  ;;  %v120_v53 = vmul.f32 %v2933_v44, %v3068_v47  ;;  %v2875_v44 = vld [vmem:[%s4364_s1 + $0x14] ss:$8 sps:$4 sm:$0xff]  }
  0x35   :  { %2844 = vrot.lane.b32.xlu0 %v4367_v3, %s2980_s11  ;;  %v2937_v54 = vpop.eup %2936  ;;  %v118_v57 = vmul.f32 %v2935_v45, %v3073_v49  ;;  %v122_v58 = vmul.f32 %v2935_v45, %v3075_v50  ;;  %2820 = vrot.lane.b32.xlu1 %v4367_v3, %s2981_s12  ;;  %v2876_v45 = vld [vmem:[%s4364_s1 + $0x1a4] ss:$8 sps:$4 sm:$0xff]  }
  0x36   :  { %v2939_v59 = vpop.eup %2938  ;;  %v3125_v60 = vpack.c.bf16 %v120_v53, %v116_v48  ;;  %v115_v61 = vmul.f32 %v2937_v54, %v3077_v51  ;;  %v119_v62 = vmul.f32 %v2937_v54, %v3079_v52  ;;  %2825 = vset.pattern.permute.xlu1 %v2975_v37  ;;  %v2871_v37 = vld [vmem:[%s4364_s1 + $0x4] ss:$8 sps:$4 sm:$0xff]  }
  0x37   :  { %v3131_v46 = vpack.c.bf16 %v122_v58, %v118_v57  ;;  %v117_v47 = vmul.f32 %v2939_v59, %v3085_v55  ;;  %v121_v63 = vmul.f32 %v2939_v59, %v3087_v56  ;;  %v2877_v53 = vld [vmem:[%s4364_s1 + $0xa4] ss:$8 sps:$4 sm:$0xff]  }
  0x38   :  { %4435 = vst [vmem:[#allocation3_spill] sm:$0xff] %v3125_v60  ;;  %2740 = vmatprep.subr.bf16.mxu0 %v3125_v60  ;;  %v3136_v49 = vpack.c.bf16 %v119_v62, %v115_v61  ;;  %v2878_v54 = vld [vmem:[%s4364_s1 + $0x124] ss:$8 sps:$4 sm:$0xff]   ;;  %v2880_v61 = vld [vmem:[%s4364_s1 + $0x1b4] ss:$8 sps:$4 sm:$0xff]  }
  0x39   :  { %4436 = vst [vmem:[#allocation4_spill] sm:$0xff] %v3131_v46  ;;  %2744 = vmatprep.subr.bf16.mxu1 %v3131_v46  ;;  %v3139_v50 = vpack.c.bf16 %v121_v63, %v117_v47  ;;  %962 = vperm.xlu1 %2825, %v3060_v23   ;;  %v2879_v59 = vld [vmem:[%s4364_s1 + $0x24] ss:$8 sps:$4 sm:$0xff]   ;;  %v2881_v62 = vld [vmem:[%s4364_s1 + $0xb4] ss:$8 sps:$4 sm:$0xff]  }
  0x3a   :  { %4437 = vst [vmem:[#allocation5_spill] sm:$0xff] %v3136_v49  ;;  %2742 = vmatpush1.bf16.msra.mxu0 %v3136_v49  ;;  %v2882_v47 = vld [vmem:[%s4364_s1 + $0x134] ss:$8 sps:$4 sm:$0xff]  }
  0x3b   :  { %4438 = vst [vmem:[#allocation6_spill] sm:$0xff] %v3139_v50  ;;  %2746 = vmatpush1.bf16.msra.mxu1 %v3139_v50  ;;  %2584 = vmatprep.subr.bf16.mxu0 %v2869_v35  ;;  %v2883_v63 = vld [vmem:[%s4364_s1 + $0x34] ss:$8 sps:$4 sm:$0xff]  }
  0x3c   :  { %2606 = vmatprep.subr.bf16.mxu1 %v2868_v33  ;;  %v2890_v35 = vld [vmem:[%s4364_s1 + $0x154] ss:$8 sps:$4 sm:$0xff]  }
  0x3d   :  { %2494 = vmatmul.mubr.msk.f32.vlgmr.msra.gmra.mrb[0].mxu0 %vm135_vm0, %v3053_v14  ;;  %2827 = vrot.lane.b32.xlu1 %v4367_v3, %s2982_s13 }
  0x3e   :  { %2496 = vmatmul.mubr.msk.f32.vlgmr.msra.gmra.mrb[0].mxu1 %vm135_vm0, %v3053_v14  ;;  %210 = vmatprep.mubr.f32.mxu0 %v4367_v3 }
  0x3f   :  { %287 = vmatprep.mubr.f32.mxu1 %v4367_v3  ;;  %2832 = vset.pattern.permute.xlu1 %v2977_v43 }
  0x40   :  { %2607 = vmatpush3.bf16.msra.mxu1 %v2870_v36  ;;  %2585 = vmatpush3.bf16.msra.mxu0 %v2871_v37  ;;  %v2891_v36 = vld [vmem:[%s4364_s1 + $0x54] ss:$8 sps:$4 sm:$0xff]   ;;  %v2892_v37 = vld [vmem:[%s4364_s1 + $0x1e4] ss:$8 sps:$4 sm:$0xff]  }
  0x41   :  { %2495 = vmatmul.mubr.msk.f32.gmra.mrb[2].mxu0 %vm135_vm0, %v3060_v23  ;;  %1054 = vperm.xlu1 %2832, %v3060_v23  }
  0x42   :  { %2497 = vmatmul.mubr.msk.f32.gmra.mrb[2].mxu1 %vm135_vm0, %v3060_v23  ;;  %2608 = vmatprep.subr.bf16.mxu1 %v2872_v38 }
  0x43   :  { %2586 = vmatprep.subr.bf16.mxu0 %v2873_v41  ;;  %v2893_v41 = vld [vmem:[%s4364_s1 + $0xe4] ss:$8 sps:$4 sm:$0xff]  }
  0x44   :  { %2609 = vmatpush3.bf16.msra.mxu1 %v2874_v42  ;;  %2587 = vmatpush3.bf16.msra.mxu0 %v2875_v44  ;;  %v3435_v42 = vld [vmem:[%s4365_s2] ss:$8 sm:$0xf]  ;;  %v2894_v44 = vld [vmem:[%s4364_s1 + $0x164] ss:$8 sps:$4 sm:$0xff]  }
  0x45   :  { %2839 = vrot.lane.b32.xlu1 %v4367_v3, %s2983_s14  ;;  %2610 = vmatprep.subr.bf16.mxu1 %v2876_v45 }
  0x46   :  { %2588 = vmatprep.subr.bf16.mxu0 %v2877_v53 }
  0x48   :  { %2611 = vmatpush3.bf16.msra.mxu1 %v2878_v54  ;;  %2589 = vmatpush3.bf16.msra.mxu0 %v2879_v59  ;;  %v2895_v54 = vld [vmem:[%s4364_s1 + $0x64] ss:$8 sps:$4 sm:$0xff]   ;;  %v3450_v59 = vld [vmem:[%s4365_s2 + $0x2] ss:$8 sm:$0xf] }
  0x49   :  { %2849 = vrot.lane.b32.xlu1 %v4367_v3, %s2984_s15  ;;  %2612 = vmatprep.subr.bf16.mxu1 %v2880_v61  ;;  %v3455_v61 = vld [vmem:[%s4365_s2 + $0x1] ss:$8 sm:$0xf] }
  0x4a   :  { %2590 = vmatprep.subr.bf16.mxu0 %v2881_v62  ;;  %v2896_v62 = vld [vmem:[%s4364_s1 + $0x1f4] ss:$8 sps:$4 sm:$0xff]  }
  0x4c   :  { %2613 = vmatpush3.bf16.msra.mxu1 %v2882_v47  ;;  %2591 = vmatpush3.bf16.msra.mxu0 %v2883_v63  ;;  %v2897_v63 = vld [vmem:[%s4364_s1 + $0xf4] ss:$8 sps:$4 sm:$0xff]  }
  0x83   :  { %v128_v51 = vpop.permute.xlu0 %127  ;;  %v3185_v9 = vpop.permute.xlu1 %321 }
  0x87   :  { %v3195_v10 = vpop.permute.xlu1 %326  ;;  %v133_v19 = vpop.permute.xlu0 %132 }
  0x88   :  { %4439 = vst [vmem:[#allocation7_spill] sm:$0xff] %v3195_v10 }
  0x8c   :  { %v3203_v12 = vpop.permute.xlu1 %428  ;;  %v3255_v22 = vpop.permute.xlu0 %424 }
  0x8d   :  { %4440 = vst [vmem:[#allocation8_spill] sm:$0xff] %v3203_v12 }
  0x91   :  { %v3215_v15 = vpop.permute.xlu1 %515  ;;  %v3265_v26 = vpop.permute.xlu0 %519 }
  0x92   :  { %4446 = vst [vmem:[#allocation14_spill] sm:$0xff] %v3265_v26 }
  0x96   :  { %v3221_v16 = vpop.permute.xlu1 %607 }
  0x98   :  { %v3277_v28 = vpop.permute.xlu0 %699 }
  0x9a   :  { %v3231_v17 = vpop.permute.xlu1 %611 }
  0x9b   :  { %4441 = vst [vmem:[#allocation9_spill] sm:$0xff] %v3231_v17 }
  0x9d   :  { %v3285_v30 = vpop.permute.xlu0 %768 }
  0x9e   :  { %4449 = vst [vmem:[#allocation17_spill] sm:$0xff] %v3285_v30 }
  0x9f   :  { %v3237_v18 = vpop.permute.xlu1 %703 }
  0xa0   :  { %4442 = vst [vmem:[#allocation10_spill] sm:$0xff] %v3237_v18 }
  0xa2   :  { %v3297_v32 = vpop.permute.xlu0 %866 }
  0xa4   :  { %v3247_v20 = vpop.permute.xlu1 %764 }
  0xa7   :  { %v3323_v40 = vpop.permute.xlu0 %958 }
  0xa8   :  { %v3259_v25 = vpop.permute.xlu1 %2808 }
  0xa9   :  { %4445 = vst [vmem:[#allocation13_spill] sm:$0xff] %v3259_v25 }
  0xac   :  { %v3271_v27 = vpop.permute.xlu1 %2813  ;;  %v3358_v58 = vpop.permute.xlu0 %1050 }
  0xad   :  { %4447 = vst [vmem:[#allocation15_spill] sm:$0xff] %v3271_v27  ;;  %4456 = vst [vmem:[#allocation24_spill] sm:$0xff] %v3358_v58 }
  0xb0   :  { %v3279_v29 = vpop.permute.xlu1 %870 }
  0xb1   :  { %4448 = vst [vmem:[#allocation16_spill] sm:$0xff] %v3279_v29 }
  0xb4   :  { %v3287_v31 = vpop.permute.xlu1 %2820 }
  0xb5   :  { %4450 = vst [vmem:[#allocation18_spill] sm:$0xff] %v3287_v31 }
  0xb8   :  { %v3302_v34 = vpop.permute.xlu1 %962 }
  0xb9   :  { %4451 = vst [vmem:[#allocation19_spill] sm:$0xff] %v3302_v34 }
  0xbc   :  { %v3331_v43 = vpop.permute.xlu1 %2827 }
  0xbd   :  { %4453 = vst [vmem:[#allocation21_spill] sm:$0xff] %v3331_v43 }
  0xc0   :  { %v3356_v57 = vpop.permute.xlu1 %1054 }
  0xc1   :  { %4455 = vst [vmem:[#allocation23_spill] sm:$0xff] %v3356_v57 }
 0x110   :  { %v206_v52 = vpop.f32.mrb[0].mxu0 }
 0x111   :  { %v3161_v55 = vadd.f32 %v206_v52, %v128_v51  ;;  %v283_v56 = vpop.f32.mrb[0].mxu1  ;;  %v208_v0 = vpop.f32.mrb[1].mxu0 }
 0x112   :  { %v285_v2 = vpop.f32.mrb[1].mxu1  ;;  %v3167_v5 = vadd.f32 %v283_v56, %v128_v51  ;;  %v3201_v11 = vadd.f32 %v208_v0, %v128_v51  ;;  %v3381_v52 = vpop.permute.xlu0 %2834  ;;  %v2884_v56 = vld [vmem:[%s4364_s1 + $0x1c4] ss:$8 sps:$4 sm:$0xff]  }
 0x113   :  { %553 = vrot.lane.b32.xlu0 %v3161_v55, %s2981_s12  ;;  %370 = vrot.lane.b32.xlu1 %v3161_v55, %s2976_s0  ;;  %v3209_v13 = vadd.f32 %v285_v2, %v128_v51  ;;  %v3379_v51 = vpop.permute.xlu1 %2839  ;;  %4457 = vst [vmem:[#allocation25_spill] sm:$0xff] %v3381_v52  ;;  %v2885_v0 = vld [vmem:[%s4364_s1 + $0xc4] ss:$8 sps:$4 sm:$0xff]  }
 0x114   :  { %v212_v4 = vpop.f32.mrb[2].mxu0  ;;  %v2886_v2 = vld [vmem:[%s4364_s1 + $0x144] ss:$8 sps:$4 sm:$0xff]   ;;  %2614 = vmatprep.subr.bf16.mxu1 %v2884_v56  ;;  %2592 = vmatprep.subr.bf16.mxu0 %v2885_v0  ;;  %v3473_v56 = vld [vmem:[%s4365_s2 + $0x3] ss:$8 sm:$0xf] }
 0x115   :  { %v289_v6 = vpop.f32.mrb[2].mxu1  ;;  %v3169_v7 = vpop.f32.mrb[3].mxu0  ;;  %v3249_v21 = vadd.f32 %v212_v4, %v133_v19  ;;  %v2887_v4 = vld [vmem:[%s4364_s1 + $0x44] ss:$8 sps:$4 sm:$0xff]   ;;  %2615 = vmatpush3.bf16.msra.mxu1 %v2886_v2  ;;  %v2898_v0 = vld [vmem:[%s4364_s1 + $0x174] ss:$8 sps:$4 sm:$0xff]  }
 0x116   :  { %v3171_v8 = vpop.f32.mrb[3].mxu1  ;;  %v3257_v24 = vadd.f32 %v289_v6, %v133_v19  ;;  %v3321_v39 = vadd.f32 %v3169_v7, %v133_v19  ;;  %v2888_v6 = vld [vmem:[%s4364_s1 + $0x1d4] ss:$8 sps:$4 sm:$0xff]   ;;  %2593 = vmatpush3.bf16.msra.mxu0 %v2887_v4  ;;  %v3411_v33 = vpop.permute.xlu0 %2844 }
 0x117   :  { %557 = vrot.lane.b32.xlu0 %v3167_v5, %s2981_s12  ;;  %374 = vrot.lane.b32.xlu1 %v3167_v5, %s2976_s0  ;;  %4443 = vst [vmem:[#allocation11_spill] sm:$0xff] %v3249_v21  ;;  %v3344_v48 = vadd.f32 %v3171_v8, %v133_v19  ;;  %v2889_v7 = vld [vmem:[%s4364_s1 + $0xd4] ss:$8 sps:$4 sm:$0xff]   ;;  %v4368_v8 = vlaneseq  ;;  %v3409_v19 = vpop.permute.xlu1 %2849  ;;  %4459 = vst [vmem:[#allocation27_spill] sm:$0xff] %v3411_v33 }
 0x118   :  { %4444 = vst [vmem:[#allocation12_spill] sm:$0xff] %v3257_v24  ;;  %4452 = vst [vmem:[#allocation20_spill] sm:$0xff] %v3321_v39  ;;  %2616 = vmatprep.subr.bf16.mxu1 %v2888_v6  ;;  %2594 = vmatprep.subr.bf16.mxu0 %v2889_v7  ;;  %v2899_v7 = vld [vmem:[%s4364_s1 + $0x74] ss:$8 sps:$4 sm:$0xff]  }
 0x119   :  { %4454 = vst [vmem:[#allocation22_spill] sm:$0xff] %v3344_v48  ;;  %4458 = vst [vmem:[#allocation26_spill] sm:$0xff] %v3409_v19  ;;  %2617 = vmatpush3.bf16.msra.mxu1 %v2890_v35  ;;  %v3423_v38 = vshrl.u32 %v4368_v8, 7  ;;  %v2810_v35 = vunpack.i.l.bf16 %v3259_v25 }
 0x11a   :  { %2595 = vmatpush3.bf16.msra.mxu0 %v2891_v36  ;;  %2618 = vmatprep.subr.bf16.mxu1 %v2892_v37  ;;  %v2900_v36 = vld [vmem:[%s4364_s1 + $0x180] ss:$8 sps:$4 sm:$0xff]  }
 0x11b   :  { %645 = vrot.lane.b32.xlu0 %v3161_v55, %s2982_s13  ;;  %462 = vrot.lane.b32.xlu1 %v3161_v55, %s2978_s9  ;;  %v3461_v47 = vsub.s32 0, %v3423_v38 }
 0x11c   :  { %2596 = vmatprep.subr.bf16.mxu0 %v2893_v41 }
 0x11d   :  { %2619 = vmatpush3.bf16.msra.mxu1 %v2894_v44  ;;  %4460 = vst [vmem:[#allocation28_spill] sm:$0xff] %v3461_v47  ;;  %v3480_v2 = vrot.slane %v3435_v42, %v3461_v47  ;;  %v3495_v37 = vrot.slane %v3450_v59, %v3461_v47  ;;  %v3503_v41 = vrot.slane %v3455_v61, %v3461_v47  ;;  %v2815_v44 = vunpack.i.l.bf16 %v3271_v27 }
 0x11e   :  { %2597 = vmatpush3.bf16.msra.mxu0 %v2895_v54  ;;  %2620 = vmatprep.subr.bf16.mxu1 %v2896_v62  ;;  %v2822_v54 = vunpack.i.l.bf16 %v3287_v31  ;;  %v3516_v3 = vrot.slane %v3473_v56, %v3461_v47 }
 0x11f   :  { %649 = vrot.lane.b32.xlu0 %v3167_v5, %s2982_s13  ;;  %466 = vrot.lane.b32.xlu1 %v3167_v5, %s2978_s9  ;;  %4461 = vst [vmem:[#allocation29_spill] sm:$0xff] %v3480_v2  ;;  %4462 = vst [vmem:[#allocation30_spill] sm:$0xff] %v3495_v37  ;;  %v452_v1 = vmul.f32 %v3503_v41, %v3255_v22  ;;  %v543_v50 = vmul.f32 %v3495_v37, %v3215_v15 }
 0x120   :  { %2598 = vmatprep.subr.bf16.mxu0 %v2897_v63  ;;  %4463 = vst [vmem:[#allocation31_spill] sm:$0xff] %v3503_v41  ;;  %v2901_v63 = vld [vmem:[%s4364_s1 + $0x80] ss:$8 sps:$4 sm:$0xff]   ;;  %4464 = vst [vmem:[#allocation32_spill] sm:$0xff] %v3516_v3 }
 0x121   :  { %2621 = vmatpush3.bf16.msra.mxu1 %v2898_v0  ;;  %v350_v0 = vmul.f32 %v3480_v2, %v3185_v9 }
 0x122   :  { %2599 = vmatpush3.bf16.msra.mxu0 %v2899_v7  ;;  %2650 = vmatprep.subr.bf16.mxu1 %v2900_v36  ;;  %v2829_v7 = vunpack.i.l.bf16 %v3331_v43 }
 0x123   :  { %814 = vrot.lane.b32.xlu0 %v3167_v5, %s2979_s10  ;;  %906 = vrot.lane.b32.xlu1 %v3167_v5, %s2983_s14 }
 0x124   :  { %2628 = vmatprep.subr.bf16.mxu0 %v2901_v63 }
 0x127   :  { %810 = vrot.lane.b32.xlu0 %v3161_v55, %s2979_s10  ;;  %902 = vrot.lane.b32.xlu1 %v3161_v55, %s2983_s14 }
 0x12b   :  { %998 = vrot.lane.b32.xlu0 %v3167_v5, %s2980_s11  ;;  %1090 = vrot.lane.b32.xlu1 %v3167_v5, %s2984_s15 }
 0x12f   :  { %994 = vrot.lane.b32.xlu0 %v3161_v55, %s2980_s11  ;;  %555 = vrot.lane.b32.xlu1 %v3201_v11, %s2981_s12 }
 0x133   :  { %372 = vrot.lane.b32.xlu0 %v3201_v11, %s2976_s0  ;;  %559 = vrot.lane.b32.xlu1 %v3209_v13, %s2981_s12 }
 0x137   :  { %376 = vrot.lane.b32.xlu0 %v3209_v13, %s2976_s0  ;;  %647 = vrot.lane.b32.xlu1 %v3201_v11, %s2982_s13 }
 0x13b   :  { %464 = vrot.lane.b32.xlu0 %v3201_v11, %s2978_s9  ;;  %651 = vrot.lane.b32.xlu1 %v3209_v13, %s2982_s13 }
 0x13f   :  { %468 = vrot.lane.b32.xlu0 %v3209_v13, %s2978_s9  ;;  %812 = vrot.lane.b32.xlu1 %v3201_v11, %s2979_s10 }
 0x143   :  { %904 = vrot.lane.b32.xlu0 %v3201_v11, %s2983_s14  ;;  %816 = vrot.lane.b32.xlu1 %v3209_v13, %s2979_s10 }
 0x147   :  { %908 = vrot.lane.b32.xlu0 %v3209_v13, %s2983_s14  ;;  %996 = vrot.lane.b32.xlu1 %v3201_v11, %s2980_s11 }
 0x14b   :  { %1088 = vrot.lane.b32.xlu0 %v3201_v11, %s2984_s15  ;;  %1000 = vrot.lane.b32.xlu1 %v3209_v13, %s2980_s11 }
 0x14f   :  { %1092 = vrot.lane.b32.xlu0 %v3209_v13, %s2984_s15  ;;  %380 = vrot.lane.b32.xlu1 %v3249_v21, %s2976_s0 }
 0x153   :  { %563 = vrot.lane.b32.xlu0 %v3249_v21, %s2981_s12  ;;  %384 = vrot.lane.b32.xlu1 %v3257_v24, %s2976_s0 }
 0x157   :  { %567 = vrot.lane.b32.xlu0 %v3257_v24, %s2981_s12  ;;  %472 = vrot.lane.b32.xlu1 %v3249_v21, %s2978_s9 }
 0x15b   :  { %655 = vrot.lane.b32.xlu0 %v3249_v21, %s2982_s13  ;;  %476 = vrot.lane.b32.xlu1 %v3257_v24, %s2978_s9 }
 0x15f   :  { %659 = vrot.lane.b32.xlu0 %v3257_v24, %s2982_s13  ;;  %820 = vrot.lane.b32.xlu1 %v3249_v21, %s2979_s10 }
 0x163   :  { %824 = vrot.lane.b32.xlu0 %v3257_v24, %s2979_s10  ;;  %916 = vrot.lane.b32.xlu1 %v3257_v24, %s2983_s14 }
 0x167   :  { %912 = vrot.lane.b32.xlu0 %v3249_v21, %s2983_s14  ;;  %1004 = vrot.lane.b32.xlu1 %v3249_v21, %s2980_s11 }
 0x16b   :  { %1008 = vrot.lane.b32.xlu0 %v3257_v24, %s2980_s11  ;;  %1100 = vrot.lane.b32.xlu1 %v3257_v24, %s2984_s15 }
 0x16f   :  { %382 = vrot.lane.b32.xlu0 %v3321_v39, %s2976_s0  ;;  %565 = vrot.lane.b32.xlu1 %v3321_v39, %s2981_s12 }
 0x173   :  { %386 = vrot.lane.b32.xlu0 %v3344_v48, %s2976_s0  ;;  %569 = vrot.lane.b32.xlu1 %v3344_v48, %s2981_s12 }
 0x177   :  { %474 = vrot.lane.b32.xlu0 %v3321_v39, %s2978_s9  ;;  %657 = vrot.lane.b32.xlu1 %v3321_v39, %s2982_s13 }
 0x17b   :  { %478 = vrot.lane.b32.xlu0 %v3344_v48, %s2978_s9  ;;  %661 = vrot.lane.b32.xlu1 %v3344_v48, %s2982_s13  ;;  %s2986_s9 = smov 32  }
 0x17f   :  { %914 = vrot.lane.b32.xlu0 %v3321_v39, %s2983_s14  ;;  %822 = vrot.lane.b32.xlu1 %v3321_v39, %s2979_s10 }
 0x183   :  { %918 = vrot.lane.b32.xlu0 %v3344_v48, %s2983_s14  ;;  %826 = vrot.lane.b32.xlu1 %v3344_v48, %s2979_s10 }
 0x185   :  { %v3440_v45 = vpop.permute.xlu0 %553  ;;  %v3442_v53 = vpop.permute.xlu1 %370 }
 0x186   :  { %v389_v62 = vsel %vm388_vm1, %v2810_v35, %v3442_v53  ;;  %v572_v36 = vsel %vm571_vm2, %v2822_v54, %v3440_v45  ;;  %v635_v54 = vmul.f32 %v3516_v3, %v3221_v16 }
 0x187   :  { %1098 = vrot.lane.b32.xlu0 %v3321_v39, %s2984_s15  ;;  %1006 = vrot.lane.b32.xlu1 %v3321_v39, %s2980_s11  ;;  %v405_v60 = vmul.f32 %v389_v62, %v350_v0 }
 0x189   :  { %v3482_v4 = vpop.permute.xlu0 %557  ;;  %v3484_v6 = vpop.permute.xlu1 %374 }
 0x18b   :  { %1102 = vrot.lane.b32.xlu0 %v3344_v48, %s2984_s15  ;;  %1010 = vrot.lane.b32.xlu1 %v3344_v48, %s2980_s11  ;;  %v588_v48 = vmul.f32 %v572_v36, %v543_v50  ;;  %v2501_v50 = vld [vmem:[%s4365_s2 + $0x4] ss:$8 sm:$0xf] }
 0x18d   :  { %v3518_v8 = vpop.permute.xlu0 %645  ;;  %v3522_v35 = vpop.permute.xlu1 %462 }
 0x18e   :  { %v480_v49 = vsel %vm135_vm0, %v2815_v44, %v3522_v35  ;;  %v664_v24 = vsel %vm663_vm3, %v2829_v7, %v3518_v8  ;;  %v3570_v7 = vrot.slane %v2501_v50, %v3461_v47 }
 0x18f   :  { %v496_v46 = vmul.f32 %v480_v49, %v452_v1  ;;  %1096 = vrot.lane.b32.xlu0 %v3249_v21, %s2984_s15  ;;  %1086 = vrot.lane.b32.xlu1 %v3161_v55, %s2984_s15  ;;  %v680_v62 = vmul.f32 %v664_v24, %v635_v54  ;;  %v3548_v49 = vsub.s32 1, %v3423_v38  ;;  %v3560_v24 = vsub.s32 2, %v3423_v38 }
 0x190   :  { %4465 = vst [vmem:[#allocation33_spill] sm:$0xff] %v3570_v7  ;;  %v3602_v34 = vmul.f32 %v3570_v7, %v3277_v28 }
 0x191   :  { %v504_v44 = vadd.f32 %v496_v46, %v405_v60  ;;  %v3539_v63 = vpop.permute.xlu0 %649  ;;  %v3541_v57 = vpop.permute.xlu1 %466  ;;  %v3573_v36 = vrot.slane %v2501_v50, %v3548_v49  ;;  %v3576_v54 = vrot.slane %v2501_v50, %v3560_v24  ;;  %v3622_v37 = vrot.slane %v3450_v59, %v3560_v24 }
 0x192   :  { %v3638_v3 = vrot.slane %v3473_v56, %v3548_v49  ;;  %v3642_v17 = vrot.slane %v3473_v56, %v3560_v24 }
 0x193   :  { %v596_v1 = vadd.f32 %v588_v48, %v504_v44  ;;  %1831 = vrot.lane.b32.xlu1 %v3053_v14, %s2980_s11  ;;  %1833 = vrot.lane.b32.xlu0 %v3060_v23, %s2980_s11  ;;  %v3563_v14 = vsub.s32 3, %v3423_v38  ;;  %4466 = vst [vmem:[#allocation34_spill] sm:$0xff] %v3573_v36  ;;  %4467 = vst [vmem:[#allocation35_spill] sm:$0xff] %v3576_v54  ;;  %v3583_v38 = vrot.slane %v3435_v42, %v3548_v49 }
 0x194   :  { %v3606_v30 = vmul.f32 %v3573_v36, %v3277_v28  ;;  %v3610_v29 = vmul.f32 %v3576_v54, %v3277_v28  ;;  %4475 = vst [vmem:[#allocation43_spill] sm:$0xff] %v3622_v37  ;;  %4477 = vst [vmem:[#allocation45_spill] sm:$0xff] %v3638_v3  ;;  %v545_v54 = vmul.f32 %v3622_v37, %v3215_v15 }
 0x195   :  { %v3553_v60 = vpop.permute.xlu0 %814  ;;  %v3555_v46 = vpop.permute.xlu1 %906  ;;  %v3557_v0 = vadd.f32 %v680_v62, %v596_v1  ;;  %v3579_v44 = vrot.slane %v2501_v50, %v3563_v14  ;;  %4469 = vst [vmem:[#allocation37_spill] sm:$0xff] %v3583_v38  ;;  %v3587_v62 = vrot.slane %v3435_v42, %v3560_v24  ;;  %v2502_v1 = vld [vmem:[%s4365_s2 + $0x5] ss:$8 sm:$0xf]  ;;  %v3598_v50 = vrot.slane %v3435_v42, %v3563_v14 }
 0x196   :  { %v3618_v42 = vrot.slane %v3450_v59, %v3548_v49  ;;  %v3626_v26 = vmul.f32 %v3583_v38, %v3185_v9  ;;  %4478 = vst [vmem:[#allocation46_spill] sm:$0xff] %v3642_v17  ;;  %v3646_v25 = vrot.slane %v3473_v56, %v3563_v14  ;;  %v3660_v38 = vrot.slane %v3455_v61, %v3560_v24  ;;  %v2503_v56 = vld [vmem:[%s4365_s2 + $0x6] ss:$8 sm:$0xf] }
 0x197   :  { %4468 = vst [vmem:[#allocation36_spill] sm:$0xff] %v3579_v44  ;;  %4470 = vst [vmem:[#allocation38_spill] sm:$0xff] %v3587_v62  ;;  %v3614_v43 = vmul.f32 %v3579_v44, %v3277_v28  ;;  %v3630_v31 = vmul.f32 %v3587_v62, %v3185_v9  ;;  %v3634_v28 = vrot.slane %v3450_v59, %v3563_v14 }
 0x198   :  { %4473 = vst [vmem:[#allocation41_spill] sm:$0xff] %v3598_v50  ;;  %4474 = vst [vmem:[#allocation42_spill] sm:$0xff] %v3618_v42  ;;  %v3652_v62 = vmul.f32 %v3598_v50, %v3185_v9  ;;  %v3656_v59 = vrot.slane %v3455_v61, %v3548_v49  ;;  %v3663_v2 = vrot.slane %v2502_v1, %v3461_v47 }
 0x199   :  { %v3565_v23 = vpop.permute.xlu0 %810  ;;  %v3567_v48 = vpop.permute.xlu1 %902  ;;  %4476 = vst [vmem:[#allocation44_spill] sm:$0xff] %v3634_v28  ;;  %4479 = vst [vmem:[#allocation47_spill] sm:$0xff] %v3646_v25  ;;  %v3678_v50 = vrot.slane %v3455_v61, %v3563_v14  ;;  %v3681_v27 = vrot.slane %v2502_v1, %v3548_v49  ;;  %v544_v44 = vmul.f32 %v3618_v42, %v3215_v15 }
 0x19a   :  { %4480 = vst [vmem:[#allocation48_spill] sm:$0xff] %v3656_v59  ;;  %4481 = vst [vmem:[#allocation49_spill] sm:$0xff] %v3660_v38  ;;  %v3691_v36 = vrot.slane %v2502_v1, %v3563_v14  ;;  %v3698_v61 = vmul.f32 %v3634_v28, %v3215_v15  ;;  %v636_v42 = vmul.f32 %v3638_v3, %v3221_v16 }
 0x19b   :  { %4482 = vst [vmem:[#allocation50_spill] sm:$0xff] %v3663_v2  ;;  %4483 = vst [vmem:[#allocation51_spill] sm:$0xff] %v3678_v50  ;;  %v3704_v37 = vmul.f32 %v3642_v17, %v3221_v16  ;;  %v3708_v7 = vmul.f32 %v3646_v25, %v3221_v16  ;;  %v453_v19 = vmul.f32 %v3656_v59, %v3255_v22 }
 0x19c   :  { %4484 = vst [vmem:[#allocation52_spill] sm:$0xff] %v3681_v27  ;;  %4486 = vst [vmem:[#allocation54_spill] sm:$0xff] %v3691_v36  ;;  %v454_v15 = vmul.f32 %v3660_v38, %v3255_v22  ;;  %v3716_v28 = vmul.f32 %v3678_v50, %v3255_v22  ;;  %v3720_v17 = vmul.f32 %v3663_v2, %v3247_v20  ;;  %v3739_v22 = vld [vmem:[%s4365_s2 + $0x20] ss:$8 sm:$0xf] }
 0x19d   :  { %v3592_v21 = vpop.permute.xlu0 %998  ;;  %v3594_v39 = vpop.permute.xlu1 %1090  ;;  %v3728_v25 = vmul.f32 %v3681_v27, %v3247_v20  ;;  %v3731_v3 = vrot.slane %v2503_v56, %v3461_v47  ;;  %v3734_v38 = vrot.slane %v2503_v56, %v3548_v49  ;;  %v3753_v27 = vrot.slane %v2503_v56, %v3563_v14 }
 0x19e   :  { %4471 = vst [vmem:[#allocation39_spill] sm:$0xff] %v3592_v21  ;;  %4472 = vst [vmem:[#allocation40_spill] sm:$0xff] %v3594_v39 }
 0x19f   :  { %4487 = vst [vmem:[#allocation55_spill] sm:$0xff] %v3731_v3  ;;  %4488 = vst [vmem:[#allocation56_spill] sm:$0xff] %v3734_v38  ;;  %v3757_v50 = vmul.f32 %v3731_v3, %v3297_v32  ;;  %v3761_v59 = vmul.f32 %v3734_v38, %v3297_v32  ;;  %v3775_v3 = vmul.f32 %v3753_v27, %v3297_v32 }
 0x1a0   :  { %4490 = vst [vmem:[#allocation58_spill] sm:$0xff] %v3753_v27  ;;  %v3797_v27 = vrot.slane %v3739_v22, %v3548_v49 }
 0x1a1   :  { %v3648_v41 = vpop.permute.xlu0 %994  ;;  %v556_v12 = vpop.permute.xlu1 %555 }
 0x1a2   :  { %v3670_v10 = vsel %vm571_vm2, %v3440_v45, %v556_v12  ;;  %v3674_v9 = vsel %vm571_vm2, %v556_v12, %v3482_v4  ;;  %v3688_v45 = vrot.slane %v2502_v1, %v3560_v24  ;;  %v2504_v12 = vld [vmem:[%s4365_s2 + $0x7] ss:$8 sm:$0xf]  ;;  %4495 = vst [vmem:[#allocation63_spill] sm:$0xff] %v3797_v27 }
 0x1a3   :  { %v3778_v58 = vrot.slane %v2504_v12, %v3560_v24  ;;  %v3781_v38 = vrot.slane %v2504_v12, %v3563_v14 }
 0x1a4   :  { %4485 = vst [vmem:[#allocation53_spill] sm:$0xff] %v3688_v45  ;;  %v3743_v2 = vmul.f32 %v3688_v45, %v3247_v20  ;;  %v3764_v45 = vrot.slane %v2504_v12, %v3461_v47 }
 0x1a5   :  { %v373_v1 = vpop.permute.xlu0 %372  ;;  %v560_v18 = vpop.permute.xlu1 %559  ;;  %4493 = vst [vmem:[#allocation61_spill] sm:$0xff] %v3778_v58  ;;  %4494 = vst [vmem:[#allocation62_spill] sm:$0xff] %v3781_v38 }
 0x1a6   :  { %v3724_v16 = vsel %vm571_vm2, %v3482_v4, %v560_v18  ;;  %v3747_v18 = vmul.f32 %v3691_v36, %v3247_v20  ;;  %v3750_v4 = vrot.slane %v2503_v56, %v3560_v24  ;;  %4491 = vst [vmem:[#allocation59_spill] sm:$0xff] %v3764_v45  ;;  %v3767_v20 = vrot.slane %v2504_v12, %v3548_v49 }
 0x1a7   :  { %v3801_v12 = vmul.f32 %v3778_v58, %v3323_v40  ;;  %v390_v49 = vsel %vm388_vm1, %v3442_v53, %v373_v1  ;;  %v391_v27 = vsel %vm388_vm1, %v373_v1, %v3484_v6 }
 0x1a8   :  { %4489 = vst [vmem:[#allocation57_spill] sm:$0xff] %v3750_v4  ;;  %4492 = vst [vmem:[#allocation60_spill] sm:$0xff] %v3767_v20  ;;  %v3771_v56 = vmul.f32 %v3750_v4, %v3297_v32  ;;  %v3789_v4 = vmul.f32 %v3764_v45, %v3323_v40  ;;  %v3793_v32 = vmul.f32 %v3767_v20, %v3323_v40  ;;  %v2836_v20 = vunpack.i.l.bf16 %v3381_v52 }
 0x1a9   :  { %v377_v36 = vpop.permute.xlu0 %376  ;;  %v648_v39 = vpop.permute.xlu1 %647  ;;  %4496 = vst [vmem:[#allocation64_spill] sm:$0xff] %v3801_v12  ;;  %v737_v45 = vmul.f32 %v3610_v29, %v3167_v5  ;;  %v589_v5 = vmul.f32 %v3670_v10, %v544_v44  ;;  %v590_v29 = vmul.f32 %v3674_v9, %v545_v54  ;;  %v591_v54 = vmul.f32 %v3724_v16, %v3698_v61 }
 0x1aa   :  { %v665_v47 = vsel %vm663_vm3, %v3518_v8, %v648_v39  ;;  %v666_v21 = vsel %vm663_vm3, %v648_v39, %v3539_v63  ;;  %v3805_v8 = vmul.f32 %v3781_v38, %v3323_v40  ;;  %v3809_v39 = vrot.slane %v3739_v22, %v3560_v24 }
 0x1ab   :  { %v736_v40 = vmul.f32 %v3606_v30, %v3201_v11  ;;  %v735_v24 = vmul.f32 %v3602_v34, %v3161_v55  ;;  %v392_v52 = vsel %vm388_vm1, %v3484_v6, %v377_v36  ;;  %v406_v11 = vmul.f32 %v390_v49, %v3626_v26 }
 0x1ac   :  { %4497 = vst [vmem:[#allocation65_spill] sm:$0xff] %v3805_v8  ;;  %4498 = vst [vmem:[#allocation66_spill] sm:$0xff] %v3809_v39  ;;  %v407_v30 = vmul.f32 %v391_v27, %v3630_v31  ;;  %v681_v36 = vmul.f32 %v665_v47, %v636_v42  ;;  %v682_v26 = vmul.f32 %v666_v21, %v3704_v37 }
 0x1ad   :  { %v465_v58 = vpop.permute.xlu0 %464  ;;  %v652_v12 = vpop.permute.xlu1 %651  ;;  %v743_v6 = vadd.f32 %v735_v24, %v3557_v0 }
 0x1ae   :  { %v481_v53 = vsel %vm135_vm0, %v3522_v35, %v465_v58  ;;  %v482_v1 = vsel %vm135_vm0, %v465_v58, %v3541_v57  ;;  %v667_v38 = vsel %vm663_vm3, %v3539_v63, %v652_v12  ;;  %v408_v35 = vmul.f32 %v392_v52, %v3652_v62 }
 0x1af   :  { %v497_v55 = vmul.f32 %v481_v53, %v453_v19  ;;  %v498_v34 = vmul.f32 %v482_v1, %v454_v15  ;;  %v683_v21 = vmul.f32 %v667_v38, %v3708_v7  ;;  %v738_v12 = vmul.f32 %v3614_v43, %v3209_v13 }
 0x1b1   :  { %v505_v58 = vadd.f32 %v497_v55, %v406_v11  ;;  %v506_v39 = vadd.f32 %v498_v34, %v407_v30  ;;  %v469_v8 = vpop.permute.xlu0 %468  ;;  %v813_v63 = vpop.permute.xlu1 %812  ;;  %v4500_v30 = vld [vmem:[#allocation39_spill] sm:$0xff]  ;;  %v3878_v34 = vrot.slane %v3739_v22, %v3563_v14 }
 0x1b2   :  { %v483_v27 = vsel %vm135_vm0, %v3541_v57, %v469_v8  ;;  %v831_v10 = vsel %vm830_vm4, %v3565_v23, %v813_v63  ;;  %v832_v31 = vsel %vm830_vm4, %v813_v63, %v3553_v60  ;;  %v4505_v63 = vld [vmem:[#allocation40_spill] sm:$0xff] }
 0x1b3   :  { %v597_v19 = vadd.f32 %v589_v5, %v505_v58  ;;  %v598_v0 = vadd.f32 %v590_v29, %v506_v39  ;;  %v499_v52 = vmul.f32 %v483_v27, %v3716_v28  ;;  %v847_v47 = vmul.f32 %v831_v10, %v3720_v17 }
 0x1b4   :  { %v848_v37 = vmul.f32 %v832_v31, %v3728_v25  ;;  %v4506_v31 = vld [vmem:[#allocation64_spill] sm:$0xff] }
 0x1b5   :  { %v507_v57 = vadd.f32 %v499_v52, %v408_v35  ;;  %v689_v44 = vadd.f32 %v681_v36, %v597_v19  ;;  %v855_v23 = vadd.f32 %v847_v47, %v743_v6  ;;  %v905_v62 = vpop.permute.xlu0 %904  ;;  %v690_v42 = vadd.f32 %v682_v26, %v598_v0  ;;  %v817_v9 = vpop.permute.xlu1 %816  ;;  %v4501_v6 = vld [vmem:[#allocation24_spill] sm:$0xff]  ;;  %v4502_v35 = vld [vmem:[#allocation63_spill] sm:$0xff]  ;;  %v4507_v0 = vld [vmem:[#allocation26_spill] sm:$0xff] }
 0x1b6   :  { %v923_v15 = vsel %vm922_vm5, %v3567_v48, %v905_v62  ;;  %v924_v17 = vsel %vm922_vm5, %v905_v62, %v3555_v46  ;;  %v833_v28 = vsel %vm830_vm4, %v3553_v60, %v817_v9  ;;  %v834_v7 = vsel %vm830_vm4, %v817_v9, %v2836_v20  ;;  %v4508_v47 = vld [vmem:[#allocation65_spill] sm:$0xff] }
 0x1b7   :  { %v599_v38 = vadd.f32 %v591_v54, %v507_v57  ;;  %v744_v25 = vadd.f32 %v736_v40, %v689_v44  ;;  %v939_v61 = vmul.f32 %v923_v15, %v3757_v50  ;;  %v940_v16 = vmul.f32 %v924_v17, %v3761_v59  ;;  %v4510_v57 = vld [vmem:[#allocation66_spill] sm:$0xff] }
 0x1b8   :  { %v745_v8 = vadd.f32 %v737_v45, %v690_v42  ;;  %v849_v48 = vmul.f32 %v833_v28, %v3743_v2  ;;  %v850_v60 = vmul.f32 %v834_v7, %v3747_v18  ;;  %v4499_v59 = vunpack.i.l.bf16 %v3379_v51 }
 0x1b9   :  { %v856_v39 = vadd.f32 %v848_v37, %v744_v25  ;;  %v947_v49 = vadd.f32 %v939_v61, %v855_v23  ;;  %v691_v24 = vadd.f32 %v683_v21, %v599_v38  ;;  %v909_v53 = vpop.permute.xlu0 %908  ;;  %v997_v20 = vpop.permute.xlu1 %996  ;;  %v2846_v18 = vunpack.i.l.bf16 %v3411_v33 }
 0x1ba   :  { %v857_v1 = vadd.f32 %v849_v48, %v745_v8  ;;  %v925_v50 = vsel %vm922_vm5, %v3555_v46, %v909_v53  ;;  %v926_v40 = vsel %vm922_vm5, %v909_v53, %v4499_v59  ;;  %v1015_v13 = vsel %vm1014_vm6, %v3648_v41, %v997_v20 }
 0x1bb   :  { %v948_v43 = vadd.f32 %v940_v16, %v856_v39  ;;  %v746_v2 = vadd.f32 %v738_v12, %v691_v24  ;;  %v941_v45 = vmul.f32 %v925_v50, %v3771_v56  ;;  %v942_v11 = vmul.f32 %v926_v40, %v3775_v3  ;;  %v4514_v40 = vld [vmem:[#allocation10_spill] sm:$0xff] }
 0x1bc   :  { %v1016_v55 = vsel %vm1014_vm6, %v997_v20, %v4500_v30  ;;  %v1031_v46 = vmul.f32 %v1015_v13, %v3789_v4  ;;  %v1079_v56 = vmul.f32 %v4502_v35, %v4501_v6  ;;  %v2851_v52 = vunpack.i.l.bf16 %v4507_v0  ;;  %v4515_v13 = vld [vmem:[#allocation33_spill] sm:$0xff] }
 0x1bd   :  { %v858_v5 = vadd.f32 %v850_v60, %v746_v2  ;;  %v949_v29 = vadd.f32 %v941_v45, %v857_v1  ;;  %v1032_v41 = vmul.f32 %v1016_v55, %v3793_v32  ;;  %v3883_v36 = vpop.permute.xlu0 %1088  ;;  %v1001_v3 = vpop.permute.xlu1 %1000  ;;  %v1080_v44 = vmul.f32 %v4510_v57, %v4501_v6  ;;  %v4516_v2 = vld [vmem:[#allocation34_spill] sm:$0xff] }
 0x1be   :  { %4503 = vst [vmem:[#allocation39_spill] sm:$0xff] %v3883_v36  ;;  %v3885_v58 = vadd.f32 %v1031_v46, %v947_v49  ;;  %v1108_v4 = vsel %vm1106_vm7, %v3883_v36, %v4505_v63  ;;  %v1017_v14 = vsel %vm1014_vm6, %v4500_v30, %v1001_v3  ;;  %v1018_v26 = vsel %vm1014_vm6, %v1001_v3, %v2846_v18  ;;  %v4518_v30 = vld [vmem:[#allocation36_spill] sm:$0xff]  ;;  %v4519_v46 = vld [vmem:[#allocation15_spill] sm:$0xff]  ;;  %v4522_v3 = vld [vmem:[#allocation37_spill] sm:$0xff] }
 0x1bf   :  { %v950_v27 = vadd.f32 %v942_v11, %v858_v5  ;;  %v1040_v10 = vadd.f32 %v1032_v41, %v948_v43  ;;  %v1124_v32 = vmul.f32 %v1108_v4, %v1079_v56  ;;  %v1033_v19 = vmul.f32 %v1017_v14, %v4506_v31  ;;  %v4517_v11 = vld [vmem:[#allocation35_spill] sm:$0xff]  ;;  %v4521_v41 = vld [vmem:[#allocation29_spill] sm:$0xff]  ;;  %v4523_v4 = vld [vmem:[#allocation38_spill] sm:$0xff] }
 0x1c0   :  { %4504 = vst [vmem:[#allocation63_spill] sm:$0xff] %v3885_v58  ;;  %v1034_v54 = vmul.f32 %v1018_v26, %v4508_v47  ;;  %v1081_v23 = vmul.f32 %v3878_v34, %v4501_v6  ;;  %v3941_v43 = vmul.f32 %v4515_v13, %v4514_v40  ;;  %v3945_v45 = vmul.f32 %v4516_v2, %v4514_v40  ;;  %v4524_v26 = vld [vmem:[#allocation8_spill] sm:$0xff]  ;;  %v4533_v13 = vld [vmem:[#allocation18_spill] sm:$0xff]  ;;  %v4544_v58 = vld [vmem:[#allocation55_spill] sm:$0xff] }
 0x1c1   :  { %v3896_v21 = vadd.f32 %v1124_v32, %v1040_v10  ;;  %v1041_v37 = vadd.f32 %v1033_v19, %v949_v29  ;;  %v1093_v62 = vpop.permute.xlu0 %1092  ;;  %v3902_v42 = vpop.permute.xlu1 %380  ;;  %v3949_v18 = vmul.f32 %v4517_v11, %v4514_v40  ;;  %v3953_v55 = vmul.f32 %v4518_v30, %v4514_v40  ;;  %v4520_v29 = vld [vmem:[#allocation7_spill] sm:$0xff]  ;;  %v4526_v19 = vld [vmem:[#allocation41_spill] sm:$0xff]  ;;  %v4527_v47 = vld [vmem:[#allocation48_spill] sm:$0xff] }
 0x1c2   :  { %v1042_v9 = vadd.f32 %v1034_v54, %v950_v27  ;;  %v1109_v15 = vsel %vm1106_vm7, %v4505_v63, %v1093_v62  ;;  %v1110_v17 = vsel %vm1106_vm7, %v1093_v62, %v2851_v52  ;;  %v2816_v5 = vunpack.i.h.bf16 %v4519_v46  ;;  %v4525_v27 = vld [vmem:[#allocation31_spill] sm:$0xff]  ;;  %v4534_v11 = vld [vmem:[#allocation45_spill] sm:$0xff]  ;;  %v4535_v46 = vld [vmem:[#allocation46_spill] sm:$0xff] }
 0x1c3   :  { %4509 = vst [vmem:[#allocation40_spill] sm:$0xff] %v3896_v21  ;;  %v1125_v28 = vmul.f32 %v1109_v15, %v1080_v44  ;;  %v1126_v7 = vmul.f32 %v1110_v17, %v1081_v23  ;;  %v354_v56 = vmul.f32 %v4521_v41, %v4520_v29  ;;  %v355_v63 = vmul.f32 %v4522_v3, %v4520_v29  ;;  %v4529_v23 = vld [vmem:[#allocation13_spill] sm:$0xff]  ;;  %v4531_v17 = vld [vmem:[#allocation32_spill] sm:$0xff]  ;;  %v4536_v41 = vld [vmem:[#allocation47_spill] sm:$0xff] }
 0x1c4   :  { %v356_v14 = vmul.f32 %v4523_v4, %v4520_v29  ;;  %v456_v10 = vmul.f32 %v4525_v27, %v4524_v26  ;;  %v357_v52 = vmul.f32 %v4526_v19, %v4520_v29  ;;  %v457_v54 = vmul.f32 %v4527_v47, %v4524_v26  ;;  %v4530_v15 = vld [vmem:[#allocation9_spill] sm:$0xff]  ;;  %v4537_v4 = vld [vmem:[#allocation14_spill] sm:$0xff]  ;;  %v4553_v36 = vld [vmem:[#allocation52_spill] sm:$0xff] }
 0x1c5   :  { %v3907_v38 = vadd.f32 %v1125_v28, %v1041_v37  ;;  %v3909_v25 = vadd.f32 %v1126_v7, %v1042_v9  ;;  %v3911_v61 = vpop.permute.xlu0 %563  ;;  %v3913_v16 = vpop.permute.xlu1 %384  ;;  %v4528_v37 = vld [vmem:[#allocation49_spill] sm:$0xff]  ;;  %v2811_v62 = vunpack.i.h.bf16 %v4529_v23  ;;  %v639_v28 = vmul.f32 %v4531_v17, %v4530_v15  ;;  %v4532_v7 = vld [vmem:[#allocation51_spill] sm:$0xff]  ;;  %v4538_v27 = vld [vmem:[#allocation30_spill] sm:$0xff] }
 0x1c6   :  { %v458_v44 = vmul.f32 %v4528_v37, %v4524_v26  ;;  %v459_v40 = vmul.f32 %v4532_v7, %v4524_v26  ;;  %v2823_v2 = vunpack.i.h.bf16 %v4533_v13  ;;  %v640_v30 = vmul.f32 %v4534_v11, %v4530_v15  ;;  %v4539_v26 = vld [vmem:[#allocation42_spill] sm:$0xff]  ;;  %v4540_v37 = vld [vmem:[#allocation43_spill] sm:$0xff]  ;;  %v4541_v17 = vld [vmem:[#allocation21_spill] sm:$0xff] }
 0x1c7   :  { %4511 = vst [vmem:[#allocation64_spill] sm:$0xff] %v3907_v38  ;;  %4512 = vst [vmem:[#allocation26_spill] sm:$0xff] %v3909_v25  ;;  %v3982_v29 = vmul.f32 %v4535_v46, %v4530_v15  ;;  %v3986_v3 = vmul.f32 %v4536_v41, %v4530_v15  ;;  %v547_v19 = vmul.f32 %v4538_v27, %v4537_v4  ;;  %v2830_v7 = vunpack.i.h.bf16 %v4541_v17  ;;  %v4542_v46 = vld [vmem:[#allocation44_spill] sm:$0xff]  ;;  %v4552_v21 = vld [vmem:[#allocation50_spill] sm:$0xff] }
 0x1c8   :  { %v548_v47 = vmul.f32 %v4539_v26, %v4537_v4  ;;  %v549_v23 = vmul.f32 %v4540_v37, %v4537_v4  ;;  %v550_v15 = vmul.f32 %v4542_v46, %v4537_v4  ;;  %v4543_v25 = vld [vmem:[#allocation16_spill] sm:$0xff]  ;;  %v576_v27 = vsel %vm571_vm2, %v2823_v2, %v3911_v61  ;;  %v4547_v37 = vld [vmem:[#allocation57_spill] sm:$0xff] }
 0x1c9   :  { %v3915_v12 = vpop.permute.xlu0 %567  ;;  %v3917_v8 = vpop.permute.xlu1 %472  ;;  %v4546_v26 = vld [vmem:[#allocation56_spill] sm:$0xff]  ;;  %v4011_v17 = vmul.f32 %v4547_v37, %v4543_v25  ;;  %v4551_v46 = vld [vmem:[#allocation17_spill] sm:$0xff] }
 0x1ca   :  { %v484_v9 = vsel %vm135_vm0, %v2816_v5, %v3917_v8  ;;  %v393_v5 = vsel %vm388_vm1, %v2811_v62, %v3902_v42  ;;  %v4001_v62 = vmul.f32 %v4544_v58, %v4543_v25  ;;  %v4007_v38 = vmul.f32 %v4546_v26, %v4543_v25  ;;  %v4554_v6 = vld [vmem:[#allocation53_spill] sm:$0xff] }
 0x1cb   :  { %v500_v13 = vmul.f32 %v484_v9, %v456_v10  ;;  %4548 = vst [vmem:[#allocation10_spill] sm:$0xff] %v4011_v17  ;;  %v4549_v10 = vld [vmem:[#allocation58_spill] sm:$0xff]  ;;  %v409_v4 = vmul.f32 %v393_v5, %v354_v56  ;;  %v4019_v58 = vmul.f32 %v4552_v21, %v4551_v46  ;;  %v797_v2 = vmul.f32 %v4553_v36, %v4551_v46  ;;  %v4556_v5 = vld [vmem:[#allocation19_spill] sm:$0xff] }
 0x1cc   :  { %4545 = vst [vmem:[#allocation66_spill] sm:$0xff] %v4001_v62  ;;  %v4015_v9 = vmul.f32 %v4549_v10, %v4543_v25  ;;  %v4025_v26 = vmul.f32 %v4554_v6, %v4551_v46  ;;  %v4555_v25 = vld [vmem:[#allocation54_spill] sm:$0xff]  ;;  %v4557_v21 = vld [vmem:[#allocation59_spill] sm:$0xff] }
 0x1cd   :  { %v3919_v48 = vpop.permute.xlu0 %655  ;;  %v3921_v39 = vpop.permute.xlu1 %476  ;;  %v4033_v56 = vmul.f32 %v4555_v25, %v4551_v46  ;;  %v4037_v10 = vmul.f32 %v4557_v21, %v4556_v5  ;;  %v508_v36 = vadd.f32 %v500_v13, %v409_v4 }
 0x1ce   :  { %4550 = vst [vmem:[#allocation33_spill] sm:$0xff] %v4015_v9  ;;  %v592_v9 = vmul.f32 %v576_v27, %v547_v19  ;;  %v668_v6 = vsel %vm663_vm3, %v2830_v7, %v3919_v48 }
 0x1cf   :  { %4558 = vst [vmem:[#allocation34_spill] sm:$0xff] %v4037_v10 }
 0x1d1   :  { %v3923_v49 = vpop.permute.xlu0 %659  ;;  %v3925_v24 = vpop.permute.xlu1 %820 }
 0x1d5   :  { %v3927_v60 = vpop.permute.xlu0 %824  ;;  %v3929_v53 = vpop.permute.xlu1 %916 }
 0x1d9   :  { %v3931_v20 = vpop.permute.xlu0 %912  ;;  %v3933_v1 = vpop.permute.xlu1 %1004 }
 0x1dd   :  { %v3935_v50 = vpop.permute.xlu0 %1008  ;;  %v3937_v59 = vpop.permute.xlu1 %1100 }
 0x1de   :  { %4513 = vst [vmem:[#allocation65_spill] sm:$0xff] %v3935_v50 }
 0x1e1   :  { %v383_v32 = vpop.permute.xlu0 %382  ;;  %v566_v31 = vpop.permute.xlu1 %565 }
 0x1e2   :  { %v394_v37 = vsel %vm388_vm1, %v3902_v42, %v383_v32  ;;  %v395_v17 = vsel %vm388_vm1, %v383_v32, %v3913_v16  ;;  %v4559_v42 = vld [vmem:[#allocation60_spill] sm:$0xff]  ;;  %v577_v32 = vsel %vm571_vm2, %v3911_v61, %v566_v31  ;;  %v578_v46 = vsel %vm571_vm2, %v566_v31, %v3915_v12  ;;  %v4561_v61 = vld [vmem:[#allocation61_spill] sm:$0xff]  ;;  %v4562_v31 = vld [vmem:[#allocation62_spill] sm:$0xff] }
 0x1e3   :  { %v4043_v50 = vmul.f32 %v4559_v42, %v4556_v5  ;;  %v410_v13 = vmul.f32 %v394_v37, %v355_v63  ;;  %v411_v7 = vmul.f32 %v395_v17, %v356_v14  ;;  %v4059_v10 = vmul.f32 %v4561_v61, %v4556_v5 }
 0x1e4   :  { %v684_v17 = vmul.f32 %v668_v6, %v639_v28  ;;  %v594_v37 = vmul.f32 %v578_v46, %v549_v23  ;;  %v4564_v23 = vld [vmem:[#allocation28_spill] sm:$0xff] }
 0x1e5   :  { %v387_v11 = vpop.permute.xlu0 %386  ;;  %v570_v41 = vpop.permute.xlu1 %569  ;;  %4560 = vst [vmem:[#allocation35_spill] sm:$0xff] %v4043_v50  ;;  %v600_v50 = vadd.f32 %v592_v9, %v508_v36  ;;  %v4077_v36 = vrot.slane %v3739_v22, %v4564_v23  ;;  %v4572_v23 = vld [vmem:[#allocation27_spill] sm:$0xff] }
 0x1e6   :  { %v396_v21 = vsel %vm388_vm1, %v3913_v16, %v387_v11  ;;  %v579_v16 = vsel %vm571_vm2, %v3915_v12, %v570_v41 }
 0x1e7   :  { %v412_v11 = vmul.f32 %v396_v21, %v357_v52  ;;  %v595_v12 = vmul.f32 %v579_v16, %v550_v15  ;;  %v692_v46 = vadd.f32 %v684_v17, %v600_v50  ;;  %v4566_v15 = vld [vmem:[#allocation11_spill] sm:$0xff] }
 0x1e8   :  { %v4567_v21 = vld [vmem:[#allocation23_spill] sm:$0xff] }
 0x1e9   :  { %v475_v62 = vpop.permute.xlu0 %474  ;;  %v658_v33 = vpop.permute.xlu1 %657 }
 0x1ea   :  { %v485_v25 = vsel %vm135_vm0, %v3917_v8, %v475_v62  ;;  %v486_v19 = vsel %vm135_vm0, %v475_v62, %v3921_v39  ;;  %v669_v42 = vsel %vm663_vm3, %v3919_v48, %v658_v33  ;;  %v4063_v8 = vmul.f32 %v4562_v31, %v4556_v5  ;;  %v4563_v5 = vld [vmem:[#allocation20_spill] sm:$0xff] }
 0x1eb   :  { %v501_v27 = vmul.f32 %v485_v25, %v457_v54  ;;  %v502_v4 = vmul.f32 %v486_v19, %v458_v44  ;;  %v593_v62 = vmul.f32 %v577_v32, %v548_v47  ;;  %v685_v19 = vmul.f32 %v669_v42, %v640_v30  ;;  %v4565_v32 = vld [vmem:[#allocation25_spill] sm:$0xff] }
 0x1ec   :  { %v670_v9 = vsel %vm663_vm3, %v658_v33, %v3923_v49  ;;  %v740_v28 = vmul.f32 %v3945_v45, %v4563_v5  ;;  %v2837_v33 = vunpack.i.h.bf16 %v4565_v32  ;;  %v1083_v42 = vmul.f32 %v4502_v35, %v4567_v21 }
 0x1ed   :  { %v509_v63 = vadd.f32 %v501_v27, %v410_v13  ;;  %v510_v14 = vadd.f32 %v502_v4, %v411_v7  ;;  %v479_v54 = vpop.permute.xlu0 %478  ;;  %v662_v44 = vpop.permute.xlu1 %661  ;;  %v686_v45 = vmul.f32 %v670_v9, %v3982_v29  ;;  %v739_v27 = vmul.f32 %v3941_v43, %v4566_v15  ;;  %v4570_v9 = vld [vmem:[#allocation65_spill] sm:$0xff] }
 0x1ee   :  { %v487_v48 = vsel %vm135_vm0, %v3921_v39, %v479_v54  ;;  %v671_v47 = vsel %vm663_vm3, %v3923_v49, %v662_v44  ;;  %v2852_v54 = vunpack.i.h.bf16 %v4507_v0 }
 0x1ef   :  { %v601_v25 = vadd.f32 %v593_v62, %v509_v63  ;;  %v503_v61 = vmul.f32 %v487_v48, %v459_v40  ;;  %v602_v41 = vadd.f32 %v594_v37, %v510_v14  ;;  %v2842_v40 = vunpack.i.h.bf16 %v3379_v51  ;;  %v4568_v63 = vld [vmem:[#allocation22_spill] sm:$0xff] }
 0x1f0   :  { %v687_v22 = vmul.f32 %v671_v47, %v3986_v3  ;;  %v1084_v51 = vmul.f32 %v4510_v57, %v4567_v21  ;;  %v742_v3 = vmul.f32 %v3953_v55, %v4568_v63  ;;  %v1085_v57 = vmul.f32 %v3878_v34, %v4567_v21 }
 0x1f1   :  { %v693_v39 = vadd.f32 %v685_v19, %v601_v25  ;;  %v511_v52 = vadd.f32 %v503_v61, %v412_v11  ;;  %v915_v6 = vpop.permute.xlu0 %914  ;;  %v823_v30 = vpop.permute.xlu1 %822  ;;  %v694_v50 = vadd.f32 %v686_v45, %v602_v41  ;;  %v747_v44 = vadd.f32 %v739_v27, %v692_v46 }
 0x1f2   :  { %v836_v49 = vsel %vm830_vm4, %v823_v30, %v3927_v60  ;;  %v835_v62 = vsel %vm830_vm4, %v3925_v24, %v823_v30  ;;  %v928_v43 = vsel %vm922_vm5, %v915_v6, %v3929_v53  ;;  %v927_v55 = vsel %vm922_vm5, %v3931_v20, %v915_v6  ;;  %v4575_v30 = vld [vmem:[#allocation33_spill] sm:$0xff] }
 0x1f3   :  { %v603_v13 = vadd.f32 %v595_v12, %v511_v52  ;;  %v748_v7 = vadd.f32 %v740_v28, %v693_v39  ;;  %v852_v4 = vmul.f32 %v836_v49, %v797_v2  ;;  %v4569_v2 = vld [vmem:[#allocation12_spill] sm:$0xff]  ;;  %v851_v0 = vmul.f32 %v835_v62, %v4019_v58  ;;  %v4573_v12 = vld [vmem:[#allocation66_spill] sm:$0xff] }
 0x1f4   :  { %v741_v35 = vmul.f32 %v3949_v18, %v4569_v2  ;;  %v944_v18 = vmul.f32 %v928_v43, %v4007_v38  ;;  %v943_v41 = vmul.f32 %v927_v55, %v4573_v12  ;;  %v4574_v52 = vld [vmem:[#allocation10_spill] sm:$0xff]  ;;  %v1082_v62 = vmul.f32 %v4077_v36, %v4567_v21 }
 0x1f5   :  { %v695_v31 = vadd.f32 %v687_v22, %v603_v13  ;;  %v919_v29 = vpop.permute.xlu0 %918  ;;  %v827_v14 = vpop.permute.xlu1 %826  ;;  %v860_v17 = vadd.f32 %v852_v4, %v748_v7  ;;  %v859_v39 = vadd.f32 %v851_v0, %v747_v44  ;;  %v2914_v12 = vld [vmem:[%s4364_s1 + $0x130] ss:$8 sps:$4 sm:$0xff]  }
 0x1f6   :  { %v837_v24 = vsel %vm830_vm4, %v3927_v60, %v827_v14  ;;  %v838_v16 = vsel %vm830_vm4, %v827_v14, %v2837_v33  ;;  %v929_v34 = vsel %vm922_vm5, %v3929_v53, %v919_v29  ;;  %v749_v11 = vadd.f32 %v741_v35, %v694_v50  ;;  %v4571_v53 = vld [vmem:[#allocation35_spill] sm:$0xff]  ;;  %v4576_v33 = vld [vmem:[#allocation34_spill] sm:$0xff] }
 0x1f7   :  { %v750_v37 = vadd.f32 %v742_v3, %v695_v31  ;;  %v853_v48 = vmul.f32 %v837_v24, %v4025_v26  ;;  %v854_v25 = vmul.f32 %v838_v16, %v4033_v56  ;;  %v930_v60 = vsel %vm922_vm5, %v919_v29, %v2842_v40  ;;  %v4577_v29 = vld [vmem:[#allocation24_spill] sm:$0xff] }
 0x1f8   :  { %v952_v5 = vadd.f32 %v944_v18, %v860_v17  ;;  %v2847_v56 = vunpack.i.h.bf16 %v4572_v23  ;;  %v945_v6 = vmul.f32 %v929_v34, %v4574_v52  ;;  %v946_v40 = vmul.f32 %v930_v60, %v4575_v30  ;;  %v4582_v34 = vld [vmem:[#allocation26_spill] sm:$0xff]  ;;  %v2917_v52 = vld [vmem:[%s4364_s1 + $0xc0] ss:$8 sps:$4 sm:$0xff]  }
 0x1f9   :  { %v1099_v19 = vpop.permute.xlu0 %1098  ;;  %v1007_v61 = vpop.permute.xlu1 %1006  ;;  %v861_v38 = vadd.f32 %v853_v48, %v749_v11  ;;  %v862_v47 = vadd.f32 %v854_v25, %v750_v37  ;;  %v951_v31 = vadd.f32 %v943_v41, %v859_v39  ;;  %v4579_v37 = vld [vmem:[#allocation40_spill] sm:$0xff]  ;;  %v4581_v48 = vld [vmem:[#allocation63_spill] sm:$0xff]  ;;  %v2912_v23 = vld [vmem:[%s4364_s1 + $0x1b0] ss:$8 sps:$4 sm:$0xff]  }
 0x1fa   :  { %v1112_v20 = vsel %vm1106_vm7, %v1099_v19, %v3937_v59  ;;  %v1019_v58 = vsel %vm1014_vm6, %v3933_v1, %v1007_v61  ;;  %v1020_v26 = vsel %vm1014_vm6, %v1007_v61, %v4570_v9  ;;  %v2902_v25 = vld [vmem:[%s4364_s1 + $0x100] ss:$8 sps:$4 sm:$0xff]   ;;  %v2904_v61 = vld [vmem:[%s4364_s1 + $0x190] ss:$8 sps:$4 sm:$0xff]  }
 0x1fb   :  { %v1036_v28 = vmul.f32 %v1020_v26, %v4571_v53  ;;  %v1128_v32 = vmul.f32 %v1112_v20, %v1083_v42  ;;  %v1035_v1 = vmul.f32 %v1019_v58, %v4576_v33  ;;  %v953_v27 = vadd.f32 %v945_v6, %v861_v38  ;;  %v2905_v20 = vld [vmem:[%s4364_s1 + $0x90] ss:$8 sps:$4 sm:$0xff]   ;;  %v2908_v26 = vld [vmem:[%s4364_s1 + $0x1a0] ss:$8 sps:$4 sm:$0xff]  }
 0x1fc   :  { %v954_v4 = vadd.f32 %v946_v40, %v862_v47  ;;  %v2906_v58 = vld [vmem:[%s4364_s1 + $0x110] ss:$8 sps:$4 sm:$0xff]   ;;  %v2909_v38 = vld [vmem:[%s4364_s1 + $0xa0] ss:$8 sps:$4 sm:$0xff]  }
 0x1fd   :  { %v1044_v46 = vadd.f32 %v1036_v28, %v952_v5  ;;  %v1103_v49 = vpop.permute.xlu0 %1102  ;;  %v1011_v45 = vpop.permute.xlu1 %1010  ;;  %v1043_v44 = vadd.f32 %v1035_v1, %v951_v31  ;;  %v4583_v47 = vld [vmem:[#allocation4_spill] sm:$0xff]  ;;  %v4584_v5 = vld [vmem:[#allocation3_spill] sm:$0xff]  ;;  %v2915_v41 = vld [vmem:[%s4364_s1 + $0x30] ss:$8 sps:$4 sm:$0xff]   ;;  %v2985_v31 = vmov 81  }
 0x1fe   :  { %v1113_v13 = vsel %vm1106_vm7, %v3937_v59, %v1103_v49  ;;  %v1114_v22 = vsel %vm1106_vm7, %v1103_v49, %v2852_v54  ;;  %v1021_v7 = vsel %vm1014_vm6, %v4570_v9, %v1011_v45  ;;  %v1022_v15 = vsel %vm1014_vm6, %v1011_v45, %v2847_v56  ;;  %v2907_v9 = vld [vmem:[%s4364_s1 + $0x10] ss:$8 sps:$4 sm:$0xff]   ;;  %v2910_v53 = vld [vmem:[%s4364_s1 + $0x120] ss:$8 sps:$4 sm:$0xff]   ;;  %2854 = vset.pattern.permute.xlu0 %v2985_v31 }
 0x1ff   :  { %v1037_v50 = vmul.f32 %v1021_v7, %v4059_v10  ;;  %v1038_v42 = vmul.f32 %v1022_v15, %v4063_v8  ;;  %v1078_v59 = vmul.f32 %v4077_v36, %v4577_v29  ;;  %v1136_v63 = vadd.f32 %v1128_v32, %v1044_v46  ;;  %v4578_v10 = vld [vmem:[#allocation39_spill] sm:$0xff]  ;;  %v4580_v36 = vld [vmem:[#allocation64_spill] sm:$0xff]  ;;  %v2913_v56 = vld [vmem:[%s4364_s1 + $0xb0] ss:$8 sps:$4 sm:$0xff]   ;;  %2853 = vset.pattern.permute.xlu1 %v2985_v31 }
 0x200   :  { %v1129_v3 = vmul.f32 %v1113_v13, %v1084_v51  ;;  %v1130_v14 = vmul.f32 %v1114_v22, %v1085_v57  ;;  %v2911_v28 = vld [vmem:[%s4364_s1 + $0x20] ss:$8 sps:$4 sm:$0xff]   ;;  %v2920_v40 = vld [vmem:[%s4364_s1 + $0x1d0] ss:$8 sps:$4 sm:$0xff]  }
 0x201   :  { %v1045_v54 = vadd.f32 %v1037_v50, %v953_v27  ;;  %v1046_v43 = vadd.f32 %v1038_v42, %v954_v4  ;;  %v1097_v2 = vpop.permute.xlu0 %1096  ;;  %v1087_v35 = vpop.permute.xlu1 %1086  ;;  %v1140_v24 = vpack.c.bf16 %v1136_v63, %v4579_v37  ;;  %v2916_v39 = vld [vmem:[%s4364_s1 + $0x1c0] ss:$8 sps:$4 sm:$0xff]   ;;  %v2921_v32 = vld [vmem:[%s4364_s1 + $0xd0] ss:$8 sps:$4 sm:$0xff]  }
 0x202   :  { %v1111_v17 = vsel %vm1106_vm7, %v1097_v2, %v1099_v19  ;;  %v1107_v8 = vsel %vm1106_vm7, %v1087_v35, %v4578_v10  ;;  %v2903_v19 = vld [vmem:[%s4364_s1] ss:$8 sps:$4 sm:$0xff]   ;;  %v2922_v33 = vld [vmem:[%s4364_s1 + $0x150] ss:$8 sps:$4 sm:$0xff]  }
 0x203   :  { %v1137_v55 = vadd.f32 %v1129_v3, %v1045_v54  ;;  %v1127_v21 = vmul.f32 %v1111_v17, %v1082_v62  ;;  %v1123_v0 = vmul.f32 %v1107_v8, %v1078_v59  ;;  %v1138_v16 = vadd.f32 %v1130_v14, %v1046_v43  ;;  %1431 = vmatprep.mubr.bf16.mxu0 %v1140_v24  ;;  %v2918_v6 = vld [vmem:[%s4364_s1 + $0x140] ss:$8 sps:$4 sm:$0xff]   ;;  %v2923_v1 = vld [vmem:[%s4364_s1 + $0x50] ss:$8 sps:$4 sm:$0xff]  }
 0x204   :  { %v2919_v30 = vld [vmem:[%s4364_s1 + $0x40] ss:$8 sps:$4 sm:$0xff]   ;;  %v2928_v22 = vld [vmem:[%s4364_s1 + $0x1f0] ss:$8 sps:$4 sm:$0xff]   ;;  %v4587_v59 = vmov 36  }
 0x205   :  { %v1141_v51 = vpack.c.bf16 %v1137_v55, %v4580_v36  ;;  %v1135_v57 = vadd.f32 %v1127_v21, %v1043_v44  ;;  %v1131_v18 = vadd.f32 %v1123_v0, %v4581_v48  ;;  %v1142_v11 = vpack.c.bf16 %v1138_v16, %v4582_v34  ;;  %v2924_v46 = vld [vmem:[%s4364_s1 + $0x1e0] ss:$8 sps:$4 sm:$0xff]   ;;  %v2929_v7 = vld [vmem:[%s4364_s1 + $0xf0] ss:$8 sps:$4 sm:$0xff]   ;;  %v1832_v42 = vpop.permute.xlu1 %1831 }
 0x206   :  { %v2925_v49 = vld [vmem:[%s4364_s1 + $0xe0] ss:$8 sps:$4 sm:$0xff]   ;;  %v2930_v15 = vld [vmem:[%s4364_s1 + $0x170] ss:$8 sps:$4 sm:$0xff]  }
 0x207   :  { %v1139_v60 = vpack.c.bf16 %v1135_v57, %v1131_v18  ;;  %1472 = vmatprep.mubr.bf16.mxu1 %v1142_v11  ;;  %v2926_v45 = vld [vmem:[%s4364_s1 + $0x160] ss:$8 sps:$4 sm:$0xff]   ;;  %v2931_v27 = vld [vmem:[%s4364_s1 + $0x70] ss:$8 sps:$4 sm:$0xff]  }
 0x208   :  { %1473 = vmatmul.mubr.bf16.vlgmr.msra.gmra.mrb[4].mxu1 %v1141_v51  ;;  %v2927_v13 = vld [vmem:[%s4364_s1 + $0x60] ss:$8 sps:$4 sm:$0xff]   ;;  %v4585_v4 = vld [vmem:[#allocation6_spill] sm:$0xff]  ;;  %v4586_v50 = vld [vmem:[#allocation5_spill] sm:$0xff] }
 0x209   :  { %2651 = vmatpush3.bf16.msra.mxu1 %v2902_v25  ;;  %1432 = vmatmul.mubr.bf16.vlgmr.msra.gmra.mrb[4].mxu0 %v1139_v60  ;;  %v4243_v62 = vld [vmem:[%s4363_s3 + $0x8] sm:$0xff]  ;;  %v4249_v29 = vld [vmem:[%s4363_s3] sm:$0xff] }
 0x20a   :  { %2629 = vmatpush3.bf16.msra.mxu0 %v2903_v19  ;;  %2652 = vmatprep.subr.bf16.mxu1 %v2904_v61 }
 0x20b   :  { %2630 = vmatprep.subr.bf16.mxu0 %v2905_v20  ;;  %1814 = vmatprep.mubr.bf16.mxu1 %v4583_v47 }
 0x20c   :  { %1773 = vmatprep.mubr.bf16.mxu0 %v4584_v5  ;;  %1828 = vperm.xlu0 %2854, %v4243_v62  }
 0x20d   :  { %2653 = vmatpush3.bf16.msra.mxu1 %v2906_v58  ;;  %1824 = vperm.xlu1 %2853, %v4249_v29   ;;  %v1834_v58 = vpop.permute.xlu0 %1833 }
 0x20e   :  { %2631 = vmatpush3.bf16.msra.mxu0 %v2907_v9  ;;  %2654 = vmatprep.subr.bf16.mxu1 %v2908_v26  ;;  %v4588_v26 = vlaneseq }
 0x20f   :  { %2632 = vmatprep.subr.bf16.mxu0 %v2909_v38 }
 0x210   :  { %v4259_v38 = vand.u32 127, %v4588_v26 }
 0x211   :  { %2655 = vmatpush3.bf16.msra.mxu1 %v2910_v53  ;;  %2856 = vset.pattern.permute.xlu1 %v4587_v59 }
 0x212   :  { %2633 = vmatpush3.bf16.msra.mxu0 %v2911_v28  ;;  %2656 = vmatprep.subr.bf16.mxu1 %v2912_v23  ;;  %vm1918_vm8 = vcmp.ge.s32.totalorder %v4259_v38, 64  ;;  %vm1933_vm10 = vcmp.eq.s32.totalorder %v4259_v38, 0 }
 0x213   :  { %2634 = vmatprep.subr.bf16.mxu0 %v2913_v56 }
 0x215   :  { %2657 = vmatpush3.bf16.msra.mxu1 %v2914_v12 }
 0x216   :  { %2635 = vmatpush3.bf16.msra.mxu0 %v2915_v41  ;;  %2658 = vmatprep.subr.bf16.mxu1 %v2916_v39 }
 0x217   :  { %2636 = vmatprep.subr.bf16.mxu0 %v2917_v52 }
 0x219   :  { %2659 = vmatpush3.bf16.msra.mxu1 %v2918_v6 }
 0x21a   :  { %2637 = vmatpush3.bf16.msra.mxu0 %v2919_v30  ;;  %2660 = vmatprep.subr.bf16.mxu1 %v2920_v40  ;;  %v1938_v30 = vld [vmem:[%s4363_s3] sm:$0xf]  ;;  %v2987_v40 = vmov 0.0|0.0  }
 0x21b   :  { %2638 = vmatprep.subr.bf16.mxu0 %v2921_v32  ;;  %v4589_v32 = vmov 0.0  }
 0x21d   :  { %2661 = vmatpush3.bf16.msra.mxu1 %v2922_v33  ;;  %v4285_v33 = vld [vmem:[%s4363_s3 + $0x10] sm:$0xff] }
 0x21e   :  { %2639 = vmatpush3.bf16.msra.mxu0 %v2923_v1  ;;  %2662 = vmatprep.subr.bf16.mxu1 %v2924_v46  ;;  %v2989_v1 = vmov 112   ;;  %v4291_v46 = vld [vmem:[%s4363_s3 + $0x18] sm:$0xff] }
 0x21f   :  { %2640 = vmatprep.subr.bf16.mxu0 %v2925_v49  ;;  %2855 = vset.pattern.permute.xlu0 %v2989_v1  ;;  %v4297_v49 = vld [vmem:[%s4363_s3 + $0x20] sm:$0xff] }
 0x221   :  { %2663 = vmatpush3.bf16.msra.mxu1 %v2926_v45  ;;  %v4303_v45 = vld [vmem:[%s4363_s3 + $0x28] sm:$0xff]  ;;  %s2994_s3 = smov 80  }
 0x222   :  { %2641 = vmatpush3.bf16.msra.mxu0 %v2927_v13  ;;  %2664 = vmatprep.subr.bf16.mxu1 %v2928_v22 }
 0x223   :  { %2642 = vmatprep.subr.bf16.mxu0 %v2929_v7 }
 0x225   :  { %2665 = vmatpush3.bf16.msra.mxu1 %v2930_v15 }
 0x226   :  { %2643 = vmatpush3.bf16.msra.mxu0 %v2931_v27  ;;  %2751 = vmatprep.subr.bf16.mxu1 %v2987_v40 }
 0x228   :  { %1815 = vmatmul.mubr.bf16.vlgmr.msra.gmra.mrb[8].mxu1 %v4585_v4 }
 0x229   :  { %1774 = vmatmul.mubr.bf16.vlgmr.msra.gmra.mrb[8].mxu0 %v4586_v50  ;;  %2707 = vmatprep.mubr.msk.f32.mxu1 %vm2988_vm9, %v4589_v32 }
 0x22a   :  { %2700 = vmatprep.mubr.msk.f32.mxu0 %vm135_vm0, %v1832_v42 }
 0x28b   :  { %v1829_v9 = vpop.permute.xlu0 %1828 }
 0x28c   :  { %v1825_v47 = vpop.permute.xlu1 %1824 }
 0x2db   :  { %v2622_v63 = vpop.f32.mrb[4].mxu1 }
 0x2dc   :  { %v2600_v3 = vpop.f32.mrb[4].mxu0  ;;  %v2623_v14 = vpop.f32.mrb[5].mxu1 }
 0x2dd   :  { %v2624_v54 = vadd.f32 %v2623_v14, %v2622_v63  ;;  %v2601_v43 = vpop.f32.mrb[5].mxu0  ;;  %v2625_v2 = vpop.f32.mrb[6].mxu1 }
 0x2de   :  { %v2602_v35 = vadd.f32 %v2601_v43, %v2600_v3  ;;  %v2603_v44 = vpop.f32.mrb[6].mxu0  ;;  %v2626_v17 = vpop.f32.mrb[7].mxu1 }
 0x2df   :  { %v2627_v10 = vadd.f32 %v2626_v17, %v2625_v2  ;;  %v2604_v8 = vpop.f32.mrb[7].mxu0 }
 0x2e0   :  { %v4253_v37 = vadd.f32 %v2624_v54, %v2602_v35  ;;  %v2605_v24 = vadd.f32 %v2604_v8, %v2603_v44 }
 0x2e2   :  { %v4255_v55 = vadd.f32 %v2627_v10, %v2605_v24 }
 0x2fb   :  { %v2666_v21 = vpop.f32.mrb[8].mxu1 }
 0x2fc   :  { %v2644_v0 = vpop.f32.mrb[8].mxu0  ;;  %v2667_v16 = vpop.f32.mrb[9].mxu1 }
 0x2fd   :  { %v2668_v36 = vadd.f32 %v2667_v16, %v2666_v21  ;;  %v2645_v51 = vpop.f32.mrb[9].mxu0  ;;  %v2669_v57 = vpop.f32.mrb[10].mxu1 }
 0x2fe   :  { %v2646_v48 = vadd.f32 %v2645_v51, %v2644_v0  ;;  %v2647_v18 = vpop.f32.mrb[10].mxu0  ;;  %v2670_v34 = vpop.f32.mrb[11].mxu1 }
 0x2ff   :  { %v2671_v11 = vadd.f32 %v2670_v34, %v2669_v57  ;;  %v2648_v25 = vpop.f32.mrb[11].mxu0  ;;  %v2991_v57 = vmov 0  }
 0x300   :  { %v1817_v19 = vadd.f32 %v2668_v36, %v2646_v48  ;;  %v2649_v61 = vadd.f32 %v2648_v25, %v2647_v18  ;;  %v2992_v48 = vmov 1  }
 0x302   :  { %v1820_v60 = vadd.f32 %v2671_v11, %v2649_v61 }
 0x304   :  { %v2747_v20 = vpack.c.bf16 %v1820_v60, %v1817_v19 }
 0x306   :  { %2748 = vmatprep.subr.bf16.mxu0 %v2747_v20 }
 0x307   :  { %2750 = vmatpush3.bf16.msra.mxu0 %v2747_v20 }
 0x30a   :  { %2701 = vmatmul.mubr.msk.f32.vlgmr.msra.gmra.mrb[12].mxu0 %vm135_vm0, %v1834_v58 }
 0x3dd   :  { %v2702_v5 = vpop.f32.mrb[12].mxu0 }
 0x3de   :  { %v4261_v53 = vadd.f32 %v2702_v5, %v1829_v9  ;;  %v1905_v28 = vpop.f32.mrb[13].mxu0 }
 0x3df   :  { %v4263_v23 = vadd.f32 %v1905_v28, %v1825_v47 }
 0x3e0   :  { %v1915_v56 = vadd.f32 %v4261_v53, %v4255_v55 }
 0x3e1   :  { %v1914_v12 = vadd.f32 %v4263_v23, %v4253_v37 }
 0x3e2   :  { %v1922_v41 = vsel %vm1918_vm8, 0.0, %v1915_v56  ;;  %v1928_v52 = vsel %vm1918_vm8, %v1915_v56, 0.0 }
 0x3e3   :  { %1925 = vadd.xlane.f32.xlu0 %v1922_v41  ;;  %v1921_v39 = vsel %vm1918_vm8, 0.0, %v1914_v12  ;;  %v1927_v6 = vsel %vm1918_vm8, %v1914_v12, 0.0 }
 0x3e4   :  { %1923 = vadd.xlane.f32.xlu1 %v1921_v39 }
 0x3e7   :  { %1931 = vadd.xlane.f32.xlu0 %v1928_v52 }
 0x3e8   :  { %1929 = vadd.xlane.f32.xlu1 %v1927_v6 }
 0x3f9   :  { %1944 = vrot.lane.b32.xlu1 %v1938_v30, %s2986_s9 }
 0x3fd   :  { %2051 = vrot.lane.b32.xlu1 %v4285_v33, %s2990_s19  ;;  %1941 = vperm.xlu0 %2855, %v1938_v30  }
 0x401   :  { %2053 = vrot.lane.b32.xlu1 %v4291_v46, %s2990_s19  ;;  %2858 = vset.pattern.permute.xlu0 %v2991_v57 }
 0x405   :  { %2055 = vrot.lane.b32.xlu1 %v4297_v49, %s2990_s19 }
 0x409   :  { %2057 = vrot.lane.b32.xlu1 %v4303_v45, %s2990_s19 }
 0x40d   :  { %2033 = vperm.xlu1 %2856, %v4285_v33  }
 0x411   :  { %2038 = vperm.xlu1 %2856, %v4291_v46  }
 0x415   :  { %2043 = vperm.xlu1 %2856, %v4297_v49  }
 0x419   :  { %2048 = vperm.xlu1 %2856, %v4303_v45  }
 0x41d   :  { %2857 = vset.pattern.permute.xlu1 %v2992_v48 }
 0x470   :  { %v1926_v13 = vpop.xlane.xlu0 %1925 }
 0x471   :  { %v1924_v22 = vpop.xlane.xlu1 %1923 }
 0x474   :  { %v1932_v7 = vpop.xlane.xlu0 %1931 }
 0x475   :  { %v1935_v15 = vsel %vm1933_vm10, %v1926_v13, %v1932_v7  ;;  %v1930_v27 = vpop.xlane.xlu1 %1929 }
 0x476   :  { %v1937_v4 = vmul.f32 0.015625, %v1935_v15  ;;  %v1934_v50 = vsel %vm1933_vm10, %v1924_v22, %v1930_v27 }
 0x477   :  { %v1936_v42 = vmul.f32 0.015625, %v1934_v50 }
 0x479   :  { %v2752_v31 = vpack.c.bf16 %v1937_v4, %v1936_v42  ;;  %v1945_v59 = vpop.permute.xlu1 %1944 }
 0x47b   :  { %2753 = vmatpush3.bf16.msra.mxu1 %v2752_v31 }
 0x47c   :  { %v1942_v3 = vpop.permute.xlu0 %1941 }
 0x47d   :  { %v2052_v63 = vpop.permute.xlu1 %2051 }
 0x47e   :  { %2708 = vmatmul.mubr.msk.f32.vlgmr.msra.gmra.mrb[12].mxu1 %vm135_vm0, %v1945_v59  ;;  %2712 = vmatprep.mubr.msk.f32.mxu0 %vm2059_vm11, %v2052_v63  ;;  %v2993_v63 = vmov 16  }
 0x47f   :  { %2722 = vmatprep.mubr.msk.f32.mxu1 %vm135_vm0, %v4285_v33 }
 0x481   :  { %v2054_v8 = vpop.permute.xlu1 %2053 }
 0x485   :  { %v2056_v16 = vpop.permute.xlu1 %2055 }
 0x489   :  { %v2058_v51 = vpop.permute.xlu1 %2057 }
 0x48d   :  { %v2034_v18 = vpop.permute.xlu1 %2033 }
 0x491   :  { %v2039_v34 = vpop.permute.xlu1 %2038 }
 0x495   :  { %v2044_v11 = vpop.permute.xlu1 %2043 }
 0x499   :  { %v2049_v61 = vpop.permute.xlu1 %2048 }
 0x551   :  { %v2014_v14 = vpop.f32.mrb[12].mxu1 }
 0x552   :  { %v2015_v54 = vadd.f32 %v2014_v14, %v1942_v3  ;;  %v2709_v43 = vpop.f32.mrb[13].mxu1 }
 0x554   :  { %v2019_v2 = vmul.f32 0.044715, %v2015_v54  ;;  %v2018_v21 = vmul.f32 0.5, %v2015_v54 }
 0x556   :  { %v2020_v35 = vmul.f32 %v2019_v2, %v2015_v54 }
 0x558   :  { %v2021_v44 = vmul.f32 %v2020_v35, %v2015_v54 }
 0x55a   :  { %v2022_v17 = vadd.f32 %v2021_v44, %v2015_v54 }
 0x55c   :  { %v2023_v10 = vmul.f32 0.7978846, %v2022_v17 }
 0x55e   :  { %2940 = vtanh.f32 %v2023_v10 }
 0x568   :  { %v2941_v24 = vpop.eup %2940 }
 0x569   :  { %v2025_v0 = vadd.f32 1.0, %v2941_v24 }
 0x56b   :  { %v2026_v36 = vmul.f32 %v2025_v0, %v2018_v21 }
 0x56d   :  { %2710 = vmatprep.subr.msk.mxu0 %vm2068_vm12, %v2026_v36 }
 0x56e   :  { %2711 = vmatpush3.msk.msra.mxu0 %vm2068_vm12, %v2026_v36 }
 0x56f   :  { %2713 = vmatmul.mubr.msk.f32.vlgmr.msra.gmra.mrb[14].mxu0 %vm2059_vm11, %v2054_v8 }
 0x570   :  { %2715 = vmatprep.mubr.msk.f32.mxu0 %vm2059_vm11, %v2056_v16 }
 0x573   :  { %2716 = vmatmul.mubr.msk.f32.gmra.mrb[16].mxu0 %vm2059_vm11, %v2058_v51 }
 0x642   :  { %v2714_v25 = vpop.f32.mrb[14].mxu0 }
 0x643   :  { %v2138_v19 = vpop.f32.mrb[15].mxu0  ;;  %v2144_v20 = vadd.f32 %v2714_v25, %v2039_v34 }
 0x644   :  { %v2139_v26 = vadd.f32 %v2138_v19, %v2034_v18 }
 0x646   :  { %v2717_v60 = vpop.f32.mrb[16].mxu0 }
 0x647   :  { %v2154_v58 = vadd.f32 %v2717_v60, %v2049_v61  ;;  %v2148_v9 = vpop.f32.mrb[17].mxu0 }
 0x648   :  { %v2149_v47 = vadd.f32 %v2148_v9, %v2044_v11 }
 0x649   :  { %v2158_v5 = vmax.f32 %v2144_v20, %v2154_v58 }
 0x64a   :  { %v2157_v28 = vmax.f32 %v2139_v26, %v2149_v47 }
 0x64b   :  { %v2160_v56 = vsub.f32 %v2144_v20, %v2158_v5  ;;  %v2166_v12 = vsub.f32 %v2154_v58, %v2158_v5 }
 0x64c   :  { %v2159_v41 = vsub.f32 %v2139_v26, %v2157_v28  ;;  %v2165_v39 = vsub.f32 %v2149_v47, %v2157_v28 }
 0x64d   :  { %v2163_v52 = vmul.f32 1.442695, %v2160_v56  ;;  %v2169_v6 = vmul.f32 1.442695, %v2166_v12 }
 0x64e   :  { %v2161_v30 = vmul.f32 1.442695, %v2159_v41  ;;  %v2167_v40 = vmul.f32 1.442695, %v2165_v39 }
 0x64f   :  { %2942 = vpow2.f32 %v2163_v52 }
 0x650   :  { %2944 = vpow2.f32 %v2169_v6 }
 0x651   :  { %2946 = vpow2.f32 %v2161_v30 }
 0x652   :  { %2948 = vpow2.f32 %v2167_v40 }
 0x659   :  { %v2943_v32 = vpop.eup %2942 }
 0x65a   :  { %v2945_v1 = vpop.eup %2944 }
 0x65b   :  { %v2947_v13 = vpop.eup %2946  ;;  %v2172_v22 = vadd.f32 %v2945_v1, %v2943_v32 }
 0x65c   :  { %v2949_v7 = vpop.eup %2948 }
 0x65d   :  { %v2171_v15 = vadd.f32 %v2949_v7, %v2947_v13  ;;  %2950 = vrcp.f32 %v2172_v22 }
 0x65f   :  { %2952 = vrcp.f32 %v2171_v15 }
 0x667   :  { %v2951_v27 = vpop.eup %2950 }
 0x668   :  { %v2176_v4 = vmul.f32 %v2951_v27, %v2943_v32  ;;  %v2178_v50 = vmul.f32 %v2951_v27, %v2945_v1  ;;  %v2995_v32 = vmov 82  }
 0x669   :  { %v2953_v42 = vpop.eup %2952 }
 0x66a   :  { %2194 = vperm.xlu0 %2858, %v2176_v4   ;;  %2186 = vperm.xlu1 %2857, %v2176_v4   ;;  %v2175_v31 = vmul.f32 %v2953_v42, %v2947_v13  ;;  %v2177_v59 = vmul.f32 %v2953_v42, %v2949_v7 }
 0x66e   :  { %2859 = vset.pattern.permute.xlu0 %v2992_v48  ;;  %2206 = vperm.xlu1 %2857, %v2178_v50  }
 0x66f   :  { %2181 = vperm.xlu0 %2859, %v2175_v31  }
 0x672   :  { %2860 = vset.pattern.permute.xlu1 %v2991_v57 }
 0x673   :  { %2862 = vset.pattern.permute.xlu0 %v2991_v57  ;;  %2190 = vperm.xlu1 %2860, %v2175_v31  }
 0x674   :  { %2210 = vperm.xlu0 %2862, %v2177_v59  }
 0x677   :  { %2861 = vset.pattern.permute.xlu1 %v2992_v48 }
 0x678   :  { %2201 = vperm.xlu1 %2861, %v2177_v59   ;;  %2864 = vset.pattern.permute.xlu0 %v2993_v63 }
 0x679   :  { %2250 = vperm.xlu0 %2864, %v4285_v33  }
 0x67c   :  { %2863 = vset.pattern.permute.xlu1 %v2991_v57 }
 0x67d   :  { %2214 = vperm.xlu1 %2863, %v2178_v50   ;;  %2262 = vperm.xlu0 %2864, %v4303_v45  }
 0x681   :  { %2865 = vset.pattern.permute.xlu1 %v2993_v63  ;;  %2404 = vrot.lane.b32.xlu0 %v4243_v62, %s2994_s3 }
 0x682   :  { %2254 = vperm.xlu1 %2865, %v4291_v46   ;;  %2867 = vset.pattern.permute.xlu0 %v2995_v32 }
 0x685   :  { %2399 = vperm.xlu0 %2867, %v4243_v62  }
 0x686   :  { %2258 = vperm.xlu1 %2865, %v4297_v49  }
 0x68a   :  { %2402 = vrot.lane.b32.xlu1 %v4249_v29, %s2994_s3 }
 0x68b   :  { %2866 = vset.pattern.permute.xlu1 %v2995_v32 }
 0x68e   :  { %2395 = vperm.xlu1 %2866, %v4249_v29  }
 0x6e9   :  { %v2187_v3 = vpop.permute.xlu1 %2186  ;;  %v2195_v14 = vpop.permute.xlu0 %2194 }
 0x6ea   :  { %v2198_v17 = vsel %vm1918_vm8, %v2187_v3, %v2195_v14 }
 0x6eb   :  { %v2220_v0 = vmul.f32 %v2198_v17, %v4255_v55 }
 0x6ed   :  { %v2207_v54 = vpop.permute.xlu1 %2206 }
 0x6ee   :  { %v2182_v43 = vpop.permute.xlu0 %2181 }
 0x6f2   :  { %v2191_v2 = vpop.permute.xlu1 %2190 }
 0x6f3   :  { %v2211_v44 = vpop.permute.xlu0 %2210  ;;  %v2197_v10 = vsel %vm1918_vm8, %v2182_v43, %v2191_v2 }
 0x6f4   :  { %v2219_v16 = vmul.f32 %v2197_v10, %v4253_v37 }
 0x6f7   :  { %v2202_v35 = vpop.permute.xlu1 %2201 }
 0x6f8   :  { %v2217_v33 = vsel %vm1918_vm8, %v2202_v35, %v2211_v44 }
 0x6f9   :  { %v2221_v8 = vmul.f32 %v2217_v33, %v4263_v23 }
 0x6fb   :  { %v4336_v51 = vadd.f32 %v2221_v8, %v2219_v16 }
 0x6fc   :  { %v2215_v24 = vpop.permute.xlu1 %2214 }
 0x6fd   :  { %v2218_v21 = vsel %vm1918_vm8, %v2207_v54, %v2215_v24 }
 0x6fe   :  { %v2222_v36 = vmul.f32 %v2218_v21, %v4261_v53 }
 0x700   :  { %v4338_v57 = vadd.f32 %v2222_v36, %v2220_v0 }
 0x701   :  { %v2255_v6 = vpop.permute.xlu1 %2254 }
 0x702   :  { %v2225_v48 = vadd.f32 %v4338_v57, %v4336_v51 }
 0x704   :  { %v2226_v18 = vrot.slane %v2225_v48, 4 }
 0x705   :  { %v2259_v30 = vpop.permute.xlu1 %2258 }
 0x706   :  { %v2227_v34 = vadd.f32 %v2226_v18, %v2225_v48 }
 0x708   :  { %v2228_v23 = vrot.slane %v2227_v34, 2 }
 0x709   :  { %v2403_v40 = vpop.permute.xlu1 %2402 }
 0x70a   :  { %v2229_v11 = vadd.f32 %v2228_v23, %v2227_v34  ;;  %2736 = vmatprep.mubr.msk.f32.mxu0 %vm2406_vm13, %v2403_v40 }
 0x70c   :  { %v2230_v25 = vrot.slane %v2229_v11, 1 }
 0x70e   :  { %v2231_v38 = vadd.f32 %v2230_v25, %v2229_v11 }
 0x710   :  { %v2232_v19 = vmul.f32 0.0625, %v2231_v38 }
 0x712   :  { %v2233_v55 = vsub.f32 %v4336_v51, %v2232_v19  ;;  %v2234_v37 = vsub.f32 %v4338_v57, %v2232_v19 }
 0x714   :  { %v2235_v61 = vmul.f32 %v2233_v55, %v2233_v55  ;;  %v2236_v53 = vmul.f32 %v2234_v37, %v2234_v37 }
 0x716   :  { %v2237_v60 = vadd.f32 %v2236_v53, %v2235_v61 }
 0x718   :  { %v2238_v20 = vrot.slane %v2237_v60, 4 }
 0x71a   :  { %v2239_v58 = vadd.f32 %v2238_v20, %v2237_v60 }
 0x71c   :  { %v2240_v9 = vrot.slane %v2239_v58, 2 }
 0x71e   :  { %v2241_v26 = vadd.f32 %v2240_v9, %v2239_v58 }
 0x720   :  { %v2242_v47 = vrot.slane %v2241_v26, 1 }
 0x722   :  { %v2243_v5 = vadd.f32 %v2242_v47, %v2241_v26  ;;  %v2396_v47 = vpop.permute.xlu1 %2395 }
 0x724   :  { %v2244_v28 = vmul.f32 0.0625, %v2243_v5 }
 0x726   :  { %v2245_v56 = vadd.f32 1e-06, %v2244_v28 }
 0x728   :  { %2954 = vrsqrt.f32 %v2245_v56 }
 0x732   :  { %v2955_v12 = vpop.eup %2954 }
 0x733   :  { %v2247_v41 = vmul.f32 %v2955_v12, %v2233_v55  ;;  %v2248_v39 = vmul.f32 %v2955_v12, %v2234_v37 }
 0x735   :  { %v2754_v52 = vpack.c.bf16 %v2248_v39, %v2247_v41 }
 0x737   :  { %2755 = vmatprep.subr.bf16.mxu1 %v2754_v52 }
 0x738   :  { %2757 = vmatpush3.bf16.msra.mxu1 %v2754_v52 }
 0x73b   :  { %2723 = vmatmul.mubr.msk.f32.vlgmr.msra.gmra.mrb[14].mxu1 %vm135_vm0, %v4291_v46  ;;  %v2251_v46 = vpop.permute.xlu0 %2250 }
 0x73c   :  { %2725 = vmatprep.mubr.msk.f32.mxu1 %vm135_vm0, %v4297_v49 }
 0x73f   :  { %2726 = vmatmul.mubr.msk.f32.gmra.mrb[16].mxu1 %vm135_vm0, %v4303_v45  ;;  %v2263_v15 = vpop.permute.xlu0 %2262 }
 0x743   :  { %v2405_v9 = vpop.permute.xlu0 %2404 }
 0x747   :  { %v2400_v26 = vpop.permute.xlu0 %2399 }
 0x80e   :  { %v2724_v1 = vpop.f32.mrb[14].mxu1 }
 0x80f   :  { %v2345_v13 = vadd.f32 %v2724_v1, %v2255_v6  ;;  %v2339_v49 = vpop.f32.mrb[15].mxu1 }
 0x810   :  { %v2340_v22 = vadd.f32 %v2339_v49, %v2251_v46 }
 0x811   :  { %v2363_v7 = vmul.f32 0.044715, %v2345_v13  ;;  %v2359_v36 = vmul.f32 0.5, %v2345_v13 }
 0x812   :  { %v2362_v45 = vmul.f32 0.044715, %v2340_v22  ;;  %v2727_v27 = vpop.f32.mrb[16].mxu1  ;;  %v2358_v18 = vmul.f32 0.5, %v2340_v22 }
 0x813   :  { %v2367_v4 = vmul.f32 %v2363_v7, %v2345_v13  ;;  %v2355_v50 = vadd.f32 %v2727_v27, %v2263_v15  ;;  %v2349_v42 = vpop.f32.mrb[17].mxu1 }
 0x814   :  { %v2366_v31 = vmul.f32 %v2362_v45, %v2340_v22  ;;  %v2350_v59 = vadd.f32 %v2349_v42, %v2259_v30 }
 0x815   :  { %v2371_v63 = vmul.f32 %v2367_v4, %v2345_v13  ;;  %v2365_v3 = vmul.f32 0.044715, %v2355_v50  ;;  %v2361_v19 = vmul.f32 0.5, %v2355_v50 }
 0x816   :  { %v2370_v14 = vmul.f32 %v2366_v31, %v2340_v22  ;;  %v2364_v62 = vmul.f32 0.044715, %v2350_v59  ;;  %v2360_v61 = vmul.f32 0.5, %v2350_v59 }
 0x817   :  { %v2369_v54 = vmul.f32 %v2365_v3, %v2355_v50  ;;  %v2375_v29 = vadd.f32 %v2371_v63, %v2345_v13 }
 0x818   :  { %v2368_v43 = vmul.f32 %v2364_v62, %v2350_v59  ;;  %v2374_v2 = vadd.f32 %v2370_v14, %v2340_v22 }
 0x819   :  { %v2373_v35 = vmul.f32 %v2369_v54, %v2355_v50  ;;  %v2379_v44 = vmul.f32 0.7978846, %v2375_v29 }
 0x81a   :  { %v2372_v33 = vmul.f32 %v2368_v43, %v2350_v59  ;;  %v2378_v17 = vmul.f32 0.7978846, %v2374_v2 }
 0x81b   :  { %2956 = vtanh.f32 %v2379_v44  ;;  %v2377_v10 = vadd.f32 %v2373_v35, %v2355_v50 }
 0x81c   :  { %2958 = vtanh.f32 %v2378_v17  ;;  %v2376_v8 = vadd.f32 %v2372_v33, %v2350_v59 }
 0x81d   :  { %v2381_v24 = vmul.f32 0.7978846, %v2377_v10 }
 0x81e   :  { %v2380_v21 = vmul.f32 0.7978846, %v2376_v8 }
 0x81f   :  { %2960 = vtanh.f32 %v2381_v24 }
 0x820   :  { %2962 = vtanh.f32 %v2380_v21 }
 0x825   :  { %v2957_v0 = vpop.eup %2956 }
 0x826   :  { %v2959_v16 = vpop.eup %2958  ;;  %v2387_v48 = vadd.f32 1.0, %v2957_v0 }
 0x827   :  { %v2386_v34 = vadd.f32 1.0, %v2959_v16 }
 0x828   :  { %v2391_v23 = vmul.f32 %v2387_v48, %v2359_v36 }
 0x829   :  { %v2961_v11 = vpop.eup %2960  ;;  %v2390_v25 = vmul.f32 %v2386_v34, %v2358_v18 }
 0x82a   :  { %v2963_v38 = vpop.eup %2962  ;;  %v2389_v55 = vadd.f32 1.0, %v2961_v11 }
 0x82b   :  { %v2758_v37 = vpack.c.bf16 %v2391_v23, %v2390_v25  ;;  %v2388_v53 = vadd.f32 1.0, %v2963_v38 }
 0x82c   :  { %v2393_v60 = vmul.f32 %v2389_v55, %v2361_v19 }
 0x82d   :  { %2759 = vmatprep.subr.bf16.mxu0 %v2758_v37  ;;  %v2392_v20 = vmul.f32 %v2388_v53, %v2360_v61 }
 0x82e   :  { %2761 = vmatpush3.bf16.msra.mxu0 %v2758_v37 }
 0x82f   :  { %v2762_v58 = vpack.c.bf16 %v2393_v60, %v2392_v20 }
 0x831   :  { %2763 = vmatprep.subr.bf16.mxu0 %v2762_v58 }
 0x832   :  { %2765 = vmatpush3.bf16.msra.mxu0 %v2762_v58 }
 0x835   :  { %2737 = vmatmul.mubr.msk.f32.vlgmr.msra.gmra.mrb[18].mxu0 %vm2406_vm13, %v2405_v9 }
 0x908   :  { %v2738_v5 = vpop.f32.mrb[18].mxu0 }
 0x909   :  { %v2483_v28 = vadd.f32 %v2738_v5, %v2400_v26  ;;  %v2477_v56 = vpop.f32.mrb[19].mxu0 }
 0x90a   :  { %v2478_v12 = vadd.f32 %v2477_v56, %v2396_v47 }
 0x90b   :  { %v2487_v41 = vadd.f32 %v2483_v28, %v4338_v57 }
 0x90c   :  { %v2486_v39 = vadd.f32 %v2478_v12, %v4336_v51 }
 0x90d   :  { %2489 = vst [vmem:[%s4366_s4 + $0x8] sm:$0xff] %v2487_v41 }
 0x90e   :  { %2488 = vst [vmem:[%s4366_s4] sm:$0xff] %v2486_v39 }

</bundles_post_ra>
